<compile_context>
chip_gen: v6e
topology: v6e:2x2x1
jax: 0.10.0
libtpu: 0.0.40
codegen_flags: <defaults>
</compile_context>

<pallas_src>
import functools

import jax
import jax.numpy as jnp
from jax.experimental import pallas as pl
from jax.experimental.pallas import tpu as pltpu

LANE = 128  # TPU lane width; all feature axes are padded to a multiple of this.


def _ceil_to(x, m):
    return -(-x // m) * m


def _pad2d(a, rows, cols):
    r, c = a.shape
    if r == rows and c == cols:
        return a
    return jnp.pad(a, ((0, rows - r), (0, cols - c)))


def _pad_cols(a, cols):
    return _pad2d(a, a.shape[0], cols)


# ----------------------------------------------------------------------------
# GAT layer as a Pallas kernel (optionally: two fused inputs, fused residual)
# ----------------------------------------------------------------------------
def _gat_kernel(*refs, two_inputs, has_residual):
    it = iter(refs)
    m_ref = next(it)            # (N, N)   additive mask: 0 or -9e15
    x1_ref = next(it)           # (N, Fp)
    w1_ref = next(it)           # (Fp, Dp)
    if two_inputs:
        x2_ref = next(it)       # (N, Fp)
        w2_ref = next(it)       # (Fp, Dp)
    b_ref = next(it)            # (1, Dp)
    phi1_ref = next(it)         # (Dp, 1)
    phi2t_ref = next(it)        # (1, Dp)
    res_ref = next(it) if has_residual else None
    out_ref = next(it)          # (N, Dp)

    # H_k = X @ W + b      (end layer: cat([X, org_X],1) @ W == X@W_top + org_X@W_bot)
    H = jnp.dot(x1_ref[...], w1_ref[...], preferred_element_type=jnp.float32)
    if two_inputs:
        H = H + jnp.dot(x2_ref[...], w2_ref[...], preferred_element_type=jnp.float32)
    H = H + b_ref[...]

    # attention logits: S[i, j] = (H phi1)[i] + (H phi2)[j]
    a1 = jnp.dot(H, phi1_ref[...], preferred_element_type=jnp.float32)     # (N, 1)
    a2 = jax.lax.dot_general(phi2t_ref[...], H, (((1,), (1,)), ((), ())),
                             preferred_element_type=jnp.float32)           # (1, N)
    S = a1 + a2

    # leaky_relu (default negative_slope = 0.01), then additive mask
    S = jnp.where(S >= 0.0, S, 0.01 * S)
    S = S + m_ref[...]          # -9e15 where (adj + I) == 0, exact same effect as where()

    # softmax over dim=1 (numerically stable); divide via EUP approx reciprocal
    S = S - jnp.max(S, axis=1, keepdims=True)
    E = jnp.exp(S)
    inv = pl.reciprocal(jnp.sum(E, axis=1, keepdims=True), approx=True)
    P = E * inv

    # TODO(synk): nn.Dropout(p) on the attention matrix is stochastic (train mode);
    # here it is the eval-mode identity.

    # h = softmax(S) @ H_k ; activation = ReLU ; (+ fused U-Net skip residual)
    h = jnp.dot(P, H, preferred_element_type=jnp.float32)
    h = jnp.maximum(h, 0.0)
    if has_residual:
        h = h + res_ref[...]
    out_ref[...] = h


def gat_forward(M, Xp, Wp, bp, phi1p, phi2tp, *, X2p=None, W2p=None, residual=None):
    """One GAT layer on lane-padded operands. Returns (N, Dp) padded output."""
    two = X2p is not None
    has_res = residual is not None
    args = [M, Xp, Wp]
    if two:
        args += [X2p, W2p]
    args += [bp, phi1p, phi2tp]
    if has_res:
        args.append(residual)

    N = Xp.shape[0]
    Dp = Wp.shape[1]
    vmem = pl.BlockSpec(memory_space=pltpu.MemorySpace.VMEM)
    kern = functools.partial(_gat_kernel, two_inputs=two, has_residual=has_res)
    return pl.pallas_call(
        kern,
        out_shape=jax.ShapeDtypeStruct((N, Dp), jnp.float32),
        in_specs=[vmem] * len(args),
        out_specs=vmem,
    )(*args)


# ----------------------------------------------------------------------------
# Parameter lane-padding helpers (traced, cheap; run once under jit)
# ----------------------------------------------------------------------------
def _prep_gat(g, fin, fout):
    Fp = _ceil_to(fin, LANE)
    Dp = _ceil_to(fout, LANE)
    Wp = _pad2d(g["W"], Fp, Dp)
    bp = _pad2d(g["b"].reshape(1, fout), 1, Dp)
    phi1p = _pad2d(g["phi"][:fout], Dp, 1)
    phi2tp = _pad2d(g["phi"][fout:].reshape(1, fout), 1, Dp)
    return Wp, bp, phi1p, phi2tp


def _prep_gat_split(g, fin_half, fout):
    # end_gcn: W is (2*fin_half, fout); split along the input axis so that
    # cat([X, org_X], 1) @ W == X @ W[:fin_half] + org_X @ W[fin_half:]
    Fp = _ceil_to(fin_half, LANE)
    Dp = _ceil_to(fout, LANE)
    W1p = _pad2d(g["W"][:fin_half], Fp, Dp)
    W2p = _pad2d(g["W"][fin_half:], Fp, Dp)
    bp = _pad2d(g["b"].reshape(1, fout), 1, Dp)
    phi1p = _pad2d(g["phi"][:fout], Dp, 1)
    phi2tp = _pad2d(g["phi"][fout:].reshape(1, fout), 1, Dp)
    return W1p, W2p, bp, phi1p, phi2tp


def additive_mask(A):
    """M = -9e15 where (adj + I) == 0 else 0. Computed once per pooling level."""
    n = A.shape[0]
    eye = jnp.eye(n, dtype=A.dtype)
    return jnp.where((A + eye) == 0.0, jnp.float32(-9.0e15), jnp.float32(0.0))


# ----------------------------------------------------------------------------
# GraphPool / GraphUnpool (plain-JAX glue under jit: top-k, gather, scatter)
# TODO(synk): these gathers/scatters could be folded into the neighboring GAT
# pallas_call via PrefetchScalarGridSpec row-gather; kept in XLA for simplicity.
# ----------------------------------------------------------------------------
def graph_pool(A, Xp, w, b, k):
    Dp = Xp.shape[1]
    w_p = jnp.pad(w, (0, Dp - w.shape[0])).reshape(Dp, 1)
    scores = (Xp @ w_p).reshape(-1) + b
    scores = jax.nn.sigmoid(scores / 100.0)
    num_nodes = A.shape[0]
    kk = int(k * num_nodes)
    assert kk >= 1, "pooling ratio produced an empty graph"
    values, idx = jax.lax.top_k(scores, kk)         # sorted descending, like torch.topk
    new_X = Xp[idx, :] * values[:, None]
    new_A = A[idx, :][:, idx]
    return new_A, new_X, idx


def graph_unpool(A, Xp, idx):
    new_X = jnp.zeros((A.shape[0], Xp.shape[1]), Xp.dtype).at[idx].set(Xp)
    return new_X


# ----------------------------------------------------------------------------
# Deterministic parameter init (mirrors shapes from the PyTorch __init__)
# ----------------------------------------------------------------------------
def init_gat(key, fin, fout):
    k1, k2 = jax.random.split(key)
    bw = (6.0 / (fin + fout)) ** 0.5                       # xavier_uniform
    W = jax.random.uniform(k1, (fin, fout), jnp.float32, -bw, bw)
    bp = (6.0 / (2 * fout + 1)) ** 0.5
    phi = jax.random.uniform(k2, (2 * fout, 1), jnp.float32, -bp, bp)
    b = jnp.zeros((fout,), jnp.float32)
    return {"W": W, "b": b, "phi": phi}


def init_pool(key, in_dim):
    k1, k2 = jax.random.split(key)
    bound = 1.0 / (in_dim ** 0.5)
    w = jax.random.uniform(k1, (in_dim,), jnp.float32, -bound, bound)
    b = jax.random.uniform(k2, (), jnp.float32, -bound, bound)
    return {"w": w, "b": b}


def init_graph_unet(key, ks, in_dim, out_dim, dim):
    keys = jax.random.split(key, 3 + 3 * len(ks))
    params = {
        "start_gcn": init_gat(keys[0], in_dim, dim),
        "bottom_gcn": init_gat(keys[1], dim, dim),
        "end_gcn": init_gat(keys[2], 2 * dim, out_dim),
        "down_gcns": [],
        "up_gcns": [],
        "pools": [],
    }
    for i in range(len(ks)):
        params["down_gcns"].append(init_gat(keys[3 + 3 * i], dim, dim))
        params["up_gcns"].append(init_gat(keys[4 + 3 * i], dim, dim))
        params["pools"].append(init_pool(keys[5 + 3 * i], dim))
    return params


# ----------------------------------------------------------------------------
# GraphUnet forward (whole thing is jitted; ks is static)
# ----------------------------------------------------------------------------
def graph_unet_forward(params, A, X, ks):
    l_n = len(ks)

    # keep X lane-padded to a multiple of 128 throughout the whole U-Net
    Xp = _pad_cols(X, _ceil_to(X.shape[1], LANE))
    M = additive_mask(A)

    sg = params["start_gcn"]
    dim = sg["W"].shape[1]
    Xp = gat_forward(M, Xp, *_prep_gat(sg, *sg["W"].shape))
    start_out_p = Xp
    org_Xp = Xp

    adj_masks, indices_list, down_outs = [], [], []
    Ai, Mi = A, M
    for i in range(l_n):
        g = params["down_gcns"][i]
        Xp = gat_forward(Mi, Xp, *_prep_gat(g, *g["W"].shape))
        adj_masks.append((Ai, Mi))
        down_outs.append(Xp)
        Ai, Xp, idx = graph_pool(Ai, Xp, params["pools"][i]["w"],
                                 params["pools"][i]["b"], ks[i])
        Mi = additive_mask(Ai)
        indices_list.append(idx)

    g = params["bottom_gcn"]
    Xp = gat_forward(Mi, Xp, *_prep_gat(g, *g["W"].shape))

    for i in range(l_n):
        up_idx = l_n - i - 1
        Ai, Mi = adj_masks[up_idx]
        idx = indices_list[up_idx]
        Xp = graph_unpool(Ai, Xp, idx)
        g = params["up_gcns"][i]
        # residual (U-Net skip) fused into the kernel epilogue
        Xp = gat_forward(Mi, Xp, *_prep_gat(g, *g["W"].shape),
                         residual=down_outs[up_idx])

    # fused concat + end_gcn: cat([X, org_X], 1) @ W == X @ W[:dim] + org_X @ W[dim:]
    eg = params["end_gcn"]
    out_dim = eg["W"].shape[1]
    W1p, W2p, bp, phi1p, phi2tp = _prep_gat_split(eg, dim, out_dim)
    Xp = gat_forward(Mi, Xp, W1p, bp, phi1p, phi2tp, X2p=org_Xp, W2p=W2p)

    return Xp[:, :out_dim], start_out_p[:, :dim]


# ----------------------------------------------------------------------------
# Main
# ----------------------------------------------------------------------------
if __name__ == "__main__":
    N = 16          # number of graph nodes
    IN_DIM = 16
    OUT_DIM = 16
    DIM = 32
    KS = (0.75, 0.5)   # pooling ratios: 16 -> 12 -> 6 nodes

    key = jax.random.PRNGKey(0)
    k_par, k_a, k_x = jax.random.split(key, 3)

    params = init_graph_unet(k_par, KS, IN_DIM, OUT_DIM, DIM)

    # dense symmetric 0/1 adjacency and node features
    A_rand = jax.random.uniform(k_a, (N, N), jnp.float32)
    A = (((A_rand + A_rand.T) * 0.5) > 0.5).astype(jnp.float32)
    X = jax.random.normal(k_x, (N, IN_DIM), jnp.float32)

    fwd = jax.jit(graph_unet_forward, static_argnames=("ks",))
    out, start_outs = fwd(params, A, X, ks=KS)
    jax.block_until_ready(out)
    jax.block_until_ready(start_outs)

    assert out.shape == (N, OUT_DIM)
    assert start_outs.shape == (N, DIM)
    print("KERNEL_OK")
</pallas_src>

<mosaic_0001>
module attributes {stable_mosaic.version = 11 : i64} {
  func.func @_gat_kernel(%arg0: memref<16x16xf32, #tpu.memory_space<vmem>>, %arg1: memref<16x128xf32, #tpu.memory_space<vmem>>, %arg2: memref<128x128xf32, #tpu.memory_space<vmem>>, %arg3: memref<1x128xf32, #tpu.memory_space<vmem>>, %arg4: memref<128x1xf32, #tpu.memory_space<vmem>>, %arg5: memref<1x128xf32, #tpu.memory_space<vmem>>, %arg6: memref<16x128xf32, #tpu.memory_space<vmem>>) attributes {dimension_semantics = [], scalar_prefetch = 0 : i64, scratch_operands = 0 : i64, tpu.core_type = #tpu.core_type<tc>} {
    %c0 = arith.constant 0 : index
    %c0_0 = arith.constant 0 : index
    %0 = vector.load %arg1[%c0, %c0_0] : memref<16x128xf32, #tpu.memory_space<vmem>>, vector<16x128xf32>
    %c0_1 = arith.constant 0 : index
    %c0_2 = arith.constant 0 : index
    %1 = vector.load %arg2[%c0_1, %c0_2] : memref<128x128xf32, #tpu.memory_space<vmem>>, vector<128x128xf32>
    %cst = arith.constant dense<0.000000e+00> : vector<16x128xf32>
    %2 = tpu.matmul %0, %1, %cst {dimension_numbers = #tpu.dot_dimension_numbers<[1], [0], [0], [1], [0, 0, 1, 1], [], []>} : vector<16x128xf32>, vector<128x128xf32>, vector<16x128xf32> -> vector<16x128xf32>
    %c0_3 = arith.constant 0 : index
    %c0_4 = arith.constant 0 : index
    %3 = vector.load %arg3[%c0_3, %c0_4] : memref<1x128xf32, #tpu.memory_space<vmem>>, vector<1x128xf32>
    %4 = vector.broadcast %3 : vector<1x128xf32> to vector<16x128xf32>
    %5 = arith.addf %2, %4 : vector<16x128xf32>
    %c0_5 = arith.constant 0 : index
    %c0_6 = arith.constant 0 : index
    %6 = vector.load %arg4[%c0_5, %c0_6] : memref<128x1xf32, #tpu.memory_space<vmem>>, vector<128x1xf32>
    %cst_7 = arith.constant dense<0.000000e+00> : vector<16x1xf32>
    %7 = tpu.matmul %5, %6, %cst_7 {dimension_numbers = #tpu.dot_dimension_numbers<[1], [0], [0], [1], [0, 0, 1, 1], [], []>} : vector<16x128xf32>, vector<128x1xf32>, vector<16x1xf32> -> vector<16x1xf32>
    %c0_8 = arith.constant 0 : index
    %c0_9 = arith.constant 0 : index
    %8 = vector.load %arg5[%c0_8, %c0_9] : memref<1x128xf32, #tpu.memory_space<vmem>>, vector<1x128xf32>
    %cst_10 = arith.constant dense<0.000000e+00> : vector<1x16xf32>
    %9 = tpu.matmul %8, %5, %cst_10 {dimension_numbers = #tpu.dot_dimension_numbers<[1], [1], [0], [0], [0, 0, 1, 0], [], []>} : vector<1x128xf32>, vector<16x128xf32>, vector<1x16xf32> -> vector<1x16xf32>
    %10 = vector.broadcast %7 : vector<16x1xf32> to vector<16x16xf32>
    %11 = vector.broadcast %9 : vector<1x16xf32> to vector<16x16xf32>
    %12 = arith.addf %10, %11 : vector<16x16xf32>
    %cst_11 = arith.constant 0.000000e+00 : f32
    %13 = vector.broadcast %cst_11 : f32 to vector<16x16xf32>
    %14 = arith.cmpf oge, %12, %13 : vector<16x16xf32>
    %cst_12 = arith.constant 0.00999999977 : f32
    %15 = vector.broadcast %cst_12 : f32 to vector<16x16xf32>
    %16 = arith.mulf %15, %12 : vector<16x16xf32>
    %17 = arith.select %14, %12, %16 : vector<16x16xi1>, vector<16x16xf32>
    %c0_13 = arith.constant 0 : index
    %c0_14 = arith.constant 0 : index
    %18 = vector.load %arg0[%c0_13, %c0_14] : memref<16x16xf32, #tpu.memory_space<vmem>>, vector<16x16xf32>
    %19 = arith.addf %17, %18 : vector<16x16xf32>
    %cst_15 = arith.constant dense<0xFF800000> : vector<16xf32>
    %20 = vector.multi_reduction <maximumf>, %19, %cst_15 [1] : vector<16x16xf32> to vector<16xf32>
    %21 = vector.shape_cast %20 : vector<16xf32> to vector<16x1xf32>
    %22 = vector.broadcast %21 : vector<16x1xf32> to vector<16x16xf32>
    %23 = arith.subf %19, %22 : vector<16x16xf32>
    %24 = math.exp %23 : vector<16x16xf32>
    %cst_16 = arith.constant dense<0.000000e+00> : vector<16xf32>
    %25 = vector.multi_reduction <add>, %24, %cst_16 [1] : vector<16x16xf32> to vector<16xf32>
    %26 = vector.shape_cast %25 : vector<16xf32> to vector<16x1xf32>
    %27 = tpu.reciprocal %26 {approx = true} : vector<16x1xf32> -> vector<16x1xf32>
    %28 = vector.broadcast %27 : vector<16x1xf32> to vector<16x16xf32>
    %29 = arith.mulf %24, %28 : vector<16x16xf32>
    %cst_17 = arith.constant dense<0.000000e+00> : vector<16x128xf32>
    %30 = tpu.matmul %29, %5, %cst_17 {dimension_numbers = #tpu.dot_dimension_numbers<[1], [0], [0], [1], [0, 0, 1, 1], [], []>} : vector<16x16xf32>, vector<16x128xf32>, vector<16x128xf32> -> vector<16x128xf32>
    %cst_18 = arith.constant 0.000000e+00 : f32
    %31 = vector.broadcast %cst_18 : f32 to vector<16x128xf32>
    %32 = arith.maximumf %30, %31 : vector<16x128xf32>
    %c0_19 = arith.constant 0 : index
    %c0_20 = arith.constant 0 : index
    %33 = vector.load %arg6[%c0_19, %c0_20] : memref<16x128xf32, #tpu.memory_space<vmem>>, vector<16x128xf32>
    tpu.vector_store %arg6[%c0_19, %c0_20], %32 {strides = array<i32>} : memref<16x128xf32, #tpu.memory_space<vmem>>, vector<16x128xf32>,
    return
  }
}

module attributes {stable_mosaic.version = 11 : i64} {
  func.func @_gat_kernel(%arg0: memref<12x12xf32, #tpu.memory_space<vmem>>, %arg1: memref<12x128xf32, #tpu.memory_space<vmem>>, %arg2: memref<128x128xf32, #tpu.memory_space<vmem>>, %arg3: memref<1x128xf32, #tpu.memory_space<vmem>>, %arg4: memref<128x1xf32, #tpu.memory_space<vmem>>, %arg5: memref<1x128xf32, #tpu.memory_space<vmem>>, %arg6: memref<12x128xf32, #tpu.memory_space<vmem>>) attributes {dimension_semantics = [], scalar_prefetch = 0 : i64, scratch_operands = 0 : i64, tpu.core_type = #tpu.core_type<tc>} {
    %c0 = arith.constant 0 : index
    %c0_0 = arith.constant 0 : index
    %0 = vector.load %arg1[%c0, %c0_0] : memref<12x128xf32, #tpu.memory_space<vmem>>, vector<12x128xf32>
    %c0_1 = arith.constant 0 : index
    %c0_2 = arith.constant 0 : index
    %1 = vector.load %arg2[%c0_1, %c0_2] : memref<128x128xf32, #tpu.memory_space<vmem>>, vector<128x128xf32>
    %cst = arith.constant dense<0.000000e+00> : vector<12x128xf32>
    %2 = tpu.matmul %0, %1, %cst {dimension_numbers = #tpu.dot_dimension_numbers<[1], [0], [0], [1], [0, 0, 1, 1], [], []>} : vector<12x128xf32>, vector<128x128xf32>, vector<12x128xf32> -> vector<12x128xf32>
    %c0_3 = arith.constant 0 : index
    %c0_4 = arith.constant 0 : index
    %3 = vector.load %arg3[%c0_3, %c0_4] : memref<1x128xf32, #tpu.memory_space<vmem>>, vector<1x128xf32>
    %4 = vector.broadcast %3 : vector<1x128xf32> to vector<12x128xf32>
    %5 = arith.addf %2, %4 : vector<12x128xf32>
    %c0_5 = arith.constant 0 : index
    %c0_6 = arith.constant 0 : index
    %6 = vector.load %arg4[%c0_5, %c0_6] : memref<128x1xf32, #tpu.memory_space<vmem>>, vector<128x1xf32>
    %cst_7 = arith.constant dense<0.000000e+00> : vector<12x1xf32>
    %7 = tpu.matmul %5, %6, %cst_7 {dimension_numbers = #tpu.dot_dimension_numbers<[1], [0], [0], [1], [0, 0, 1, 1], [], []>} : vector<12x128xf32>, vector<128x1xf32>, vector<12x1xf32> -> vector<12x1xf32>
    %c0_8 = arith.constant 0 : index
    %c0_9 = arith.constant 0 : index
    %8 = vector.load %arg5[%c0_8, %c0_9] : memref<1x128xf32, #tpu.memory_space<vmem>>, vector<1x128xf32>
    %cst_10 = arith.constant dense<0.000000e+00> : vector<1x12xf32>
    %9 = tpu.matmul %8, %5, %cst_10 {dimension_numbers = #tpu.dot_dimension_numbers<[1], [1], [0], [0], [0, 0, 1, 0], [], []>} : vector<1x128xf32>, vector<12x128xf32>, vector<1x12xf32> -> vector<1x12xf32>
    %10 = vector.broadcast %7 : vector<12x1xf32> to vector<12x12xf32>
    %11 = vector.broadcast %9 : vector<1x12xf32> to vector<12x12xf32>
    %12 = arith.addf %10, %11 : vector<12x12xf32>
    %cst_11 = arith.constant 0.000000e+00 : f32
    %13 = vector.broadcast %cst_11 : f32 to vector<12x12xf32>
    %14 = arith.cmpf oge, %12, %13 : vector<12x12xf32>
    %cst_12 = arith.constant 0.00999999977 : f32
    %15 = vector.broadcast %cst_12 : f32 to vector<12x12xf32>
    %16 = arith.mulf %15, %12 : vector<12x12xf32>
    %17 = arith.select %14, %12, %16 : vector<12x12xi1>, vector<12x12xf32>
    %c0_13 = arith.constant 0 : index
    %c0_14 = arith.constant 0 : index
    %18 = vector.load %arg0[%c0_13, %c0_14] : memref<12x12xf32, #tpu.memory_space<vmem>>, vector<12x12xf32>
    %19 = arith.addf %17, %18 : vector<12x12xf32>
    %cst_15 = arith.constant dense<0xFF800000> : vector<12xf32>
    %20 = vector.multi_reduction <maximumf>, %19, %cst_15 [1] : vector<12x12xf32> to vector<12xf32>
    %21 = vector.shape_cast %20 : vector<12xf32> to vector<12x1xf32>
    %22 = vector.broadcast %21 : vector<12x1xf32> to vector<12x12xf32>
    %23 = arith.subf %19, %22 : vector<12x12xf32>
    %24 = math.exp %23 : vector<12x12xf32>
    %cst_16 = arith.constant dense<0.000000e+00> : vector<12xf32>
    %25 = vector.multi_reduction <add>, %24, %cst_16 [1] : vector<12x12xf32> to vector<12xf32>
    %26 = vector.shape_cast %25 : vector<12xf32> to vector<12x1xf32>
    %27 = tpu.reciprocal %26 {approx = true} : vector<12x1xf32> -> vector<12x1xf32>
    %28 = vector.broadcast %27 : vector<12x1xf32> to vector<12x12xf32>
    %29 = arith.mulf %24, %28 : vector<12x12xf32>
    %cst_17 = arith.constant dense<0.000000e+00> : vector<12x128xf32>
    %30 = tpu.matmul %29, %5, %cst_17 {dimension_numbers = #tpu.dot_dimension_numbers<[1], [0], [0], [1], [0, 0, 1, 1], [], []>} : vector<12x12xf32>, vector<12x128xf32>, vector<12x128xf32> -> vector<12x128xf32>
    %cst_18 = arith.constant 0.000000e+00 : f32
    %31 = vector.broadcast %cst_18 : f32 to vector<12x128xf32>
    %32 = arith.maximumf %30, %31 : vector<12x128xf32>
    %c0_19 = arith.constant 0 : index
    %c0_20 = arith.constant 0 : index
    %33 = vector.load %arg6[%c0_19, %c0_20] : memref<12x128xf32, #tpu.memory_space<vmem>>, vector<12x128xf32>
    tpu.vector_store %arg6[%c0_19, %c0_20], %32 {strides = array<i32>} : memref<12x128xf32, #tpu.memory_space<vmem>>, vector<12x128xf32>,
    return
  }
}

module attributes {stable_mosaic.version = 11 : i64} {
  func.func @_gat_kernel(%arg0: memref<6x6xf32, #tpu.memory_space<vmem>>, %arg1: memref<6x128xf32, #tpu.memory_space<vmem>>, %arg2: memref<128x128xf32, #tpu.memory_space<vmem>>, %arg3: memref<1x128xf32, #tpu.memory_space<vmem>>, %arg4: memref<128x1xf32, #tpu.memory_space<vmem>>, %arg5: memref<1x128xf32, #tpu.memory_space<vmem>>, %arg6: memref<6x128xf32, #tpu.memory_space<vmem>>) attributes {dimension_semantics = [], scalar_prefetch = 0 : i64, scratch_operands = 0 : i64, tpu.core_type = #tpu.core_type<tc>} {
    %c0 = arith.constant 0 : index
    %c0_0 = arith.constant 0 : index
    %0 = vector.load %arg1[%c0, %c0_0] : memref<6x128xf32, #tpu.memory_space<vmem>>, vector<6x128xf32>
    %c0_1 = arith.constant 0 : index
    %c0_2 = arith.constant 0 : index
    %1 = vector.load %arg2[%c0_1, %c0_2] : memref<128x128xf32, #tpu.memory_space<vmem>>, vector<128x128xf32>
    %cst = arith.constant dense<0.000000e+00> : vector<6x128xf32>
    %2 = tpu.matmul %0, %1, %cst {dimension_numbers = #tpu.dot_dimension_numbers<[1], [0], [0], [1], [0, 0, 1, 1], [], []>} : vector<6x128xf32>, vector<128x128xf32>, vector<6x128xf32> -> vector<6x128xf32>
    %c0_3 = arith.constant 0 : index
    %c0_4 = arith.constant 0 : index
    %3 = vector.load %arg3[%c0_3, %c0_4] : memref<1x128xf32, #tpu.memory_space<vmem>>, vector<1x128xf32>
    %4 = vector.broadcast %3 : vector<1x128xf32> to vector<6x128xf32>
    %5 = arith.addf %2, %4 : vector<6x128xf32>
    %c0_5 = arith.constant 0 : index
    %c0_6 = arith.constant 0 : index
    %6 = vector.load %arg4[%c0_5, %c0_6] : memref<128x1xf32, #tpu.memory_space<vmem>>, vector<128x1xf32>
    %cst_7 = arith.constant dense<0.000000e+00> : vector<6x1xf32>
    %7 = tpu.matmul %5, %6, %cst_7 {dimension_numbers = #tpu.dot_dimension_numbers<[1], [0], [0], [1], [0, 0, 1, 1], [], []>} : vector<6x128xf32>, vector<128x1xf32>, vector<6x1xf32> -> vector<6x1xf32>
    %c0_8 = arith.constant 0 : index
    %c0_9 = arith.constant 0 : index
    %8 = vector.load %arg5[%c0_8, %c0_9] : memref<1x128xf32, #tpu.memory_space<vmem>>, vector<1x128xf32>
    %cst_10 = arith.constant dense<0.000000e+00> : vector<1x6xf32>
    %9 = tpu.matmul %8, %5, %cst_10 {dimension_numbers = #tpu.dot_dimension_numbers<[1], [1], [0], [0], [0, 0, 1, 0], [], []>} : vector<1x128xf32>, vector<6x128xf32>, vector<1x6xf32> -> vector<1x6xf32>
    %10 = vector.broadcast %7 : vector<6x1xf32> to vector<6x6xf32>
    %11 = vector.broadcast %9 : vector<1x6xf32> to vector<6x6xf32>
    %12 = arith.addf %10, %11 : vector<6x6xf32>
    %cst_11 = arith.constant 0.000000e+00 : f32
    %13 = vector.broadcast %cst_11 : f32 to vector<6x6xf32>
    %14 = arith.cmpf oge, %12, %13 : vector<6x6xf32>
    %cst_12 = arith.constant 0.00999999977 : f32
    %15 = vector.broadcast %cst_12 : f32 to vector<6x6xf32>
    %16 = arith.mulf %15, %12 : vector<6x6xf32>
    %17 = arith.select %14, %12, %16 : vector<6x6xi1>, vector<6x6xf32>
    %c0_13 = arith.constant 0 : index
    %c0_14 = arith.constant 0 : index
    %18 = vector.load %arg0[%c0_13, %c0_14] : memref<6x6xf32, #tpu.memory_space<vmem>>, vector<6x6xf32>
    %19 = arith.addf %17, %18 : vector<6x6xf32>
    %cst_15 = arith.constant dense<0xFF800000> : vector<6xf32>
    %20 = vector.multi_reduction <maximumf>, %19, %cst_15 [1] : vector<6x6xf32> to vector<6xf32>
    %21 = vector.shape_cast %20 : vector<6xf32> to vector<6x1xf32>
    %22 = vector.broadcast %21 : vector<6x1xf32> to vector<6x6xf32>
    %23 = arith.subf %19, %22 : vector<6x6xf32>
    %24 = math.exp %23 : vector<6x6xf32>
    %cst_16 = arith.constant dense<0.000000e+00> : vector<6xf32>
    %25 = vector.multi_reduction <add>, %24, %cst_16 [1] : vector<6x6xf32> to vector<6xf32>
    %26 = vector.shape_cast %25 : vector<6xf32> to vector<6x1xf32>
    %27 = tpu.reciprocal %26 {approx = true} : vector<6x1xf32> -> vector<6x1xf32>
    %28 = vector.broadcast %27 : vector<6x1xf32> to vector<6x6xf32>
    %29 = arith.mulf %24, %28 : vector<6x6xf32>
    %cst_17 = arith.constant dense<0.000000e+00> : vector<6x128xf32>
    %30 = tpu.matmul %29, %5, %cst_17 {dimension_numbers = #tpu.dot_dimension_numbers<[1], [0], [0], [1], [0, 0, 1, 1], [], []>} : vector<6x6xf32>, vector<6x128xf32>, vector<6x128xf32> -> vector<6x128xf32>
    %cst_18 = arith.constant 0.000000e+00 : f32
    %31 = vector.broadcast %cst_18 : f32 to vector<6x128xf32>
    %32 = arith.maximumf %30, %31 : vector<6x128xf32>
    %c0_19 = arith.constant 0 : index
    %c0_20 = arith.constant 0 : index
    %33 = vector.load %arg6[%c0_19, %c0_20] : memref<6x128xf32, #tpu.memory_space<vmem>>, vector<6x128xf32>
    tpu.vector_store %arg6[%c0_19, %c0_20], %32 {strides = array<i32>} : memref<6x128xf32, #tpu.memory_space<vmem>>, vector<6x128xf32>,
    return
  }
}

module attributes {stable_mosaic.version = 11 : i64} {
  func.func @_gat_kernel(%arg0: memref<12x12xf32, #tpu.memory_space<vmem>>, %arg1: memref<12x128xf32, #tpu.memory_space<vmem>>, %arg2: memref<128x128xf32, #tpu.memory_space<vmem>>, %arg3: memref<1x128xf32, #tpu.memory_space<vmem>>, %arg4: memref<128x1xf32, #tpu.memory_space<vmem>>, %arg5: memref<1x128xf32, #tpu.memory_space<vmem>>, %arg6: memref<12x128xf32, #tpu.memory_space<vmem>>, %arg7: memref<12x128xf32, #tpu.memory_space<vmem>>) attributes {dimension_semantics = [], scalar_prefetch = 0 : i64, scratch_operands = 0 : i64, tpu.core_type = #tpu.core_type<tc>} {
    %c0 = arith.constant 0 : index
    %c0_0 = arith.constant 0 : index
    %0 = vector.load %arg1[%c0, %c0_0] : memref<12x128xf32, #tpu.memory_space<vmem>>, vector<12x128xf32>
    %c0_1 = arith.constant 0 : index
    %c0_2 = arith.constant 0 : index
    %1 = vector.load %arg2[%c0_1, %c0_2] : memref<128x128xf32, #tpu.memory_space<vmem>>, vector<128x128xf32>
    %cst = arith.constant dense<0.000000e+00> : vector<12x128xf32>
    %2 = tpu.matmul %0, %1, %cst {dimension_numbers = #tpu.dot_dimension_numbers<[1], [0], [0], [1], [0, 0, 1, 1], [], []>} : vector<12x128xf32>, vector<128x128xf32>, vector<12x128xf32> -> vector<12x128xf32>
    %c0_3 = arith.constant 0 : index
    %c0_4 = arith.constant 0 : index
    %3 = vector.load %arg3[%c0_3, %c0_4] : memref<1x128xf32, #tpu.memory_space<vmem>>, vector<1x128xf32>
    %4 = vector.broadcast %3 : vector<1x128xf32> to vector<12x128xf32>
    %5 = arith.addf %2, %4 : vector<12x128xf32>
    %c0_5 = arith.constant 0 : index
    %c0_6 = arith.constant 0 : index
    %6 = vector.load %arg4[%c0_5, %c0_6] : memref<128x1xf32, #tpu.memory_space<vmem>>, vector<128x1xf32>
    %cst_7 = arith.constant dense<0.000000e+00> : vector<12x1xf32>
    %7 = tpu.matmul %5, %6, %cst_7 {dimension_numbers = #tpu.dot_dimension_numbers<[1], [0], [0], [1], [0, 0, 1, 1], [], []>} : vector<12x128xf32>, vector<128x1xf32>, vector<12x1xf32> -> vector<12x1xf32>
    %c0_8 = arith.constant 0 : index
    %c0_9 = arith.constant 0 : index
    %8 = vector.load %arg5[%c0_8, %c0_9] : memref<1x128xf32, #tpu.memory_space<vmem>>, vector<1x128xf32>
    %cst_10 = arith.constant dense<0.000000e+00> : vector<1x12xf32>
    %9 = tpu.matmul %8, %5, %cst_10 {dimension_numbers = #tpu.dot_dimension_numbers<[1], [1], [0], [0], [0, 0, 1, 0], [], []>} : vector<1x128xf32>, vector<12x128xf32>, vector<1x12xf32> -> vector<1x12xf32>
    %10 = vector.broadcast %7 : vector<12x1xf32> to vector<12x12xf32>
    %11 = vector.broadcast %9 : vector<1x12xf32> to vector<12x12xf32>
    %12 = arith.addf %10, %11 : vector<12x12xf32>
    %cst_11 = arith.constant 0.000000e+00 : f32
    %13 = vector.broadcast %cst_11 : f32 to vector<12x12xf32>
    %14 = arith.cmpf oge, %12, %13 : vector<12x12xf32>
    %cst_12 = arith.constant 0.00999999977 : f32
    %15 = vector.broadcast %cst_12 : f32 to vector<12x12xf32>
    %16 = arith.mulf %15, %12 : vector<12x12xf32>
    %17 = arith.select %14, %12, %16 : vector<12x12xi1>, vector<12x12xf32>
    %c0_13 = arith.constant 0 : index
    %c0_14 = arith.constant 0 : index
    %18 = vector.load %arg0[%c0_13, %c0_14] : memref<12x12xf32, #tpu.memory_space<vmem>>, vector<12x12xf32>
    %19 = arith.addf %17, %18 : vector<12x12xf32>
    %cst_15 = arith.constant dense<0xFF800000> : vector<12xf32>
    %20 = vector.multi_reduction <maximumf>, %19, %cst_15 [1] : vector<12x12xf32> to vector<12xf32>
    %21 = vector.shape_cast %20 : vector<12xf32> to vector<12x1xf32>
    %22 = vector.broadcast %21 : vector<12x1xf32> to vector<12x12xf32>
    %23 = arith.subf %19, %22 : vector<12x12xf32>
    %24 = math.exp %23 : vector<12x12xf32>
    %cst_16 = arith.constant dense<0.000000e+00> : vector<12xf32>
    %25 = vector.multi_reduction <add>, %24, %cst_16 [1] : vector<12x12xf32> to vector<12xf32>
    %26 = vector.shape_cast %25 : vector<12xf32> to vector<12x1xf32>
    %27 = tpu.reciprocal %26 {approx = true} : vector<12x1xf32> -> vector<12x1xf32>
    %28 = vector.broadcast %27 : vector<12x1xf32> to vector<12x12xf32>
    %29 = arith.mulf %24, %28 : vector<12x12xf32>
    %cst_17 = arith.constant dense<0.000000e+00> : vector<12x128xf32>
    %30 = tpu.matmul %29, %5, %cst_17 {dimension_numbers = #tpu.dot_dimension_numbers<[1], [0], [0], [1], [0, 0, 1, 1], [], []>} : vector<12x12xf32>, vector<12x128xf32>, vector<12x128xf32> -> vector<12x128xf32>
    %cst_18 = arith.constant 0.000000e+00 : f32
    %31 = vector.broadcast %cst_18 : f32 to vector<12x128xf32>
    %32 = arith.maximumf %30, %31 : vector<12x128xf32>
    %c0_19 = arith.constant 0 : index
    %c0_20 = arith.constant 0 : index
    %33 = vector.load %arg6[%c0_19, %c0_20] : memref<12x128xf32, #tpu.memory_space<vmem>>, vector<12x128xf32>
    %34 = arith.addf %32, %33 : vector<12x128xf32>
    %c0_21 = arith.constant 0 : index
    %c0_22 = arith.constant 0 : index
    %35 = vector.load %arg7[%c0_21, %c0_22] : memref<12x128xf32, #tpu.memory_space<vmem>>, vector<12x128xf32>
    tpu.vector_store %arg7[%c0_21, %c0_22], %34 {strides = array<i32>} : memref<12x128xf32, #tpu.memory_space<vmem>>, vector<12x128xf32>,
    return
  }
}

module attributes {stable_mosaic.version = 11 : i64} {
  func.func @_gat_kernel(%arg0: memref<16x16xf32, #tpu.memory_space<vmem>>, %arg1: memref<16x128xf32, #tpu.memory_space<vmem>>, %arg2: memref<128x128xf32, #tpu.memory_space<vmem>>, %arg3: memref<1x128xf32, #tpu.memory_space<vmem>>, %arg4: memref<128x1xf32, #tpu.memory_space<vmem>>, %arg5: memref<1x128xf32, #tpu.memory_space<vmem>>, %arg6: memref<16x128xf32, #tpu.memory_space<vmem>>, %arg7: memref<16x128xf32, #tpu.memory_space<vmem>>) attributes {dimension_semantics = [], scalar_prefetch = 0 : i64, scratch_operands = 0 : i64, tpu.core_type = #tpu.core_type<tc>} {
    %c0 = arith.constant 0 : index
    %c0_0 = arith.constant 0 : index
    %0 = vector.load %arg1[%c0, %c0_0] : memref<16x128xf32, #tpu.memory_space<vmem>>, vector<16x128xf32>
    %c0_1 = arith.constant 0 : index
    %c0_2 = arith.constant 0 : index
    %1 = vector.load %arg2[%c0_1, %c0_2] : memref<128x128xf32, #tpu.memory_space<vmem>>, vector<128x128xf32>
    %cst = arith.constant dense<0.000000e+00> : vector<16x128xf32>
    %2 = tpu.matmul %0, %1, %cst {dimension_numbers = #tpu.dot_dimension_numbers<[1], [0], [0], [1], [0, 0, 1, 1], [], []>} : vector<16x128xf32>, vector<128x128xf32>, vector<16x128xf32> -> vector<16x128xf32>
    %c0_3 = arith.constant 0 : index
    %c0_4 = arith.constant 0 : index
    %3 = vector.load %arg3[%c0_3, %c0_4] : memref<1x128xf32, #tpu.memory_space<vmem>>, vector<1x128xf32>
    %4 = vector.broadcast %3 : vector<1x128xf32> to vector<16x128xf32>
    %5 = arith.addf %2, %4 : vector<16x128xf32>
    %c0_5 = arith.constant 0 : index
    %c0_6 = arith.constant 0 : index
    %6 = vector.load %arg4[%c0_5, %c0_6] : memref<128x1xf32, #tpu.memory_space<vmem>>, vector<128x1xf32>
    %cst_7 = arith.constant dense<0.000000e+00> : vector<16x1xf32>
    %7 = tpu.matmul %5, %6, %cst_7 {dimension_numbers = #tpu.dot_dimension_numbers<[1], [0], [0], [1], [0, 0, 1, 1], [], []>} : vector<16x128xf32>, vector<128x1xf32>, vector<16x1xf32> -> vector<16x1xf32>
    %c0_8 = arith.constant 0 : index
    %c0_9 = arith.constant 0 : index
    %8 = vector.load %arg5[%c0_8, %c0_9] : memref<1x128xf32, #tpu.memory_space<vmem>>, vector<1x128xf32>
    %cst_10 = arith.constant dense<0.000000e+00> : vector<1x16xf32>
    %9 = tpu.matmul %8, %5, %cst_10 {dimension_numbers = #tpu.dot_dimension_numbers<[1], [1], [0], [0], [0, 0, 1, 0], [], []>} : vector<1x128xf32>, vector<16x128xf32>, vector<1x16xf32> -> vector<1x16xf32>
    %10 = vector.broadcast %7 : vector<16x1xf32> to vector<16x16xf32>
    %11 = vector.broadcast %9 : vector<1x16xf32> to vector<16x16xf32>
    %12 = arith.addf %10, %11 : vector<16x16xf32>
    %cst_11 = arith.constant 0.000000e+00 : f32
    %13 = vector.broadcast %cst_11 : f32 to vector<16x16xf32>
    %14 = arith.cmpf oge, %12, %13 : vector<16x16xf32>
    %cst_12 = arith.constant 0.00999999977 : f32
    %15 = vector.broadcast %cst_12 : f32 to vector<16x16xf32>
    %16 = arith.mulf %15, %12 : vector<16x16xf32>
    %17 = arith.select %14, %12, %16 : vector<16x16xi1>, vector<16x16xf32>
    %c0_13 = arith.constant 0 : index
    %c0_14 = arith.constant 0 : index
    %18 = vector.load %arg0[%c0_13, %c0_14] : memref<16x16xf32, #tpu.memory_space<vmem>>, vector<16x16xf32>
    %19 = arith.addf %17, %18 : vector<16x16xf32>
    %cst_15 = arith.constant dense<0xFF800000> : vector<16xf32>
    %20 = vector.multi_reduction <maximumf>, %19, %cst_15 [1] : vector<16x16xf32> to vector<16xf32>
    %21 = vector.shape_cast %20 : vector<16xf32> to vector<16x1xf32>
    %22 = vector.broadcast %21 : vector<16x1xf32> to vector<16x16xf32>
    %23 = arith.subf %19, %22 : vector<16x16xf32>
    %24 = math.exp %23 : vector<16x16xf32>
    %cst_16 = arith.constant dense<0.000000e+00> : vector<16xf32>
    %25 = vector.multi_reduction <add>, %24, %cst_16 [1] : vector<16x16xf32> to vector<16xf32>
    %26 = vector.shape_cast %25 : vector<16xf32> to vector<16x1xf32>
    %27 = tpu.reciprocal %26 {approx = true} : vector<16x1xf32> -> vector<16x1xf32>
    %28 = vector.broadcast %27 : vector<16x1xf32> to vector<16x16xf32>
    %29 = arith.mulf %24, %28 : vector<16x16xf32>
    %cst_17 = arith.constant dense<0.000000e+00> : vector<16x128xf32>
    %30 = tpu.matmul %29, %5, %cst_17 {dimension_numbers = #tpu.dot_dimension_numbers<[1], [0], [0], [1], [0, 0, 1, 1], [], []>} : vector<16x16xf32>, vector<16x128xf32>, vector<16x128xf32> -> vector<16x128xf32>
    %cst_18 = arith.constant 0.000000e+00 : f32
    %31 = vector.broadcast %cst_18 : f32 to vector<16x128xf32>
    %32 = arith.maximumf %30, %31 : vector<16x128xf32>
    %c0_19 = arith.constant 0 : index
    %c0_20 = arith.constant 0 : index
    %33 = vector.load %arg6[%c0_19, %c0_20] : memref<16x128xf32, #tpu.memory_space<vmem>>, vector<16x128xf32>
    %34 = arith.addf %32, %33 : vector<16x128xf32>
    %c0_21 = arith.constant 0 : index
    %c0_22 = arith.constant 0 : index
    %35 = vector.load %arg7[%c0_21, %c0_22] : memref<16x128xf32, #tpu.memory_space<vmem>>, vector<16x128xf32>
    tpu.vector_store %arg7[%c0_21, %c0_22], %34 {strides = array<i32>} : memref<16x128xf32, #tpu.memory_space<vmem>>, vector<16x128xf32>,
    return
  }
}

module attributes {stable_mosaic.version = 11 : i64} {
  func.func @_gat_kernel(%arg0: memref<16x16xf32, #tpu.memory_space<vmem>>, %arg1: memref<16x128xf32, #tpu.memory_space<vmem>>, %arg2: memref<128x128xf32, #tpu.memory_space<vmem>>, %arg3: memref<16x128xf32, #tpu.memory_space<vmem>>, %arg4: memref<128x128xf32, #tpu.memory_space<vmem>>, %arg5: memref<1x128xf32, #tpu.memory_space<vmem>>, %arg6: memref<128x1xf32, #tpu.memory_space<vmem>>, %arg7: memref<1x128xf32, #tpu.memory_space<vmem>>, %arg8: memref<16x128xf32, #tpu.memory_space<vmem>>) attributes {dimension_semantics = [], scalar_prefetch = 0 : i64, scratch_operands = 0 : i64, tpu.core_type = #tpu.core_type<tc>} {
    %c0 = arith.constant 0 : index
    %c0_0 = arith.constant 0 : index
    %0 = vector.load %arg1[%c0, %c0_0] : memref<16x128xf32, #tpu.memory_space<vmem>>, vector<16x128xf32>
    %c0_1 = arith.constant 0 : index
    %c0_2 = arith.constant 0 : index
    %1 = vector.load %arg2[%c0_1, %c0_2] : memref<128x128xf32, #tpu.memory_space<vmem>>, vector<128x128xf32>
    %cst = arith.constant dense<0.000000e+00> : vector<16x128xf32>
    %2 = tpu.matmul %0, %1, %cst {dimension_numbers = #tpu.dot_dimension_numbers<[1], [0], [0], [1], [0, 0, 1, 1], [], []>} : vector<16x128xf32>, vector<128x128xf32>, vector<16x128xf32> -> vector<16x128xf32>
    %c0_3 = arith.constant 0 : index
    %c0_4 = arith.constant 0 : index
    %3 = vector.load %arg3[%c0_3, %c0_4] : memref<16x128xf32, #tpu.memory_space<vmem>>, vector<16x128xf32>
    %c0_5 = arith.constant 0 : index
    %c0_6 = arith.constant 0 : index
    %4 = vector.load %arg4[%c0_5, %c0_6] : memref<128x128xf32, #tpu.memory_space<vmem>>, vector<128x128xf32>
    %cst_7 = arith.constant dense<0.000000e+00> : vector<16x128xf32>
    %5 = tpu.matmul %3, %4, %cst_7 {dimension_numbers = #tpu.dot_dimension_numbers<[1], [0], [0], [1], [0, 0, 1, 1], [], []>} : vector<16x128xf32>, vector<128x128xf32>, vector<16x128xf32> -> vector<16x128xf32>
    %6 = arith.addf %2, %5 : vector<16x128xf32>
    %c0_8 = arith.constant 0 : index
    %c0_9 = arith.constant 0 : index
    %7 = vector.load %arg5[%c0_8, %c0_9] : memref<1x128xf32, #tpu.memory_space<vmem>>, vector<1x128xf32>
    %8 = vector.broadcast %7 : vector<1x128xf32> to vector<16x128xf32>
    %9 = arith.addf %6, %8 : vector<16x128xf32>
    %c0_10 = arith.constant 0 : index
    %c0_11 = arith.constant 0 : index
    %10 = vector.load %arg6[%c0_10, %c0_11] : memref<128x1xf32, #tpu.memory_space<vmem>>, vector<128x1xf32>
    %cst_12 = arith.constant dense<0.000000e+00> : vector<16x1xf32>
    %11 = tpu.matmul %9, %10, %cst_12 {dimension_numbers = #tpu.dot_dimension_numbers<[1], [0], [0], [1], [0, 0, 1, 1], [], []>} : vector<16x128xf32>, vector<128x1xf32>, vector<16x1xf32> -> vector<16x1xf32>
    %c0_13 = arith.constant 0 : index
    %c0_14 = arith.constant 0 : index
    %12 = vector.load %arg7[%c0_13, %c0_14] : memref<1x128xf32, #tpu.memory_space<vmem>>, vector<1x128xf32>
    %cst_15 = arith.constant dense<0.000000e+00> : vector<1x16xf32>
    %13 = tpu.matmul %12, %9, %cst_15 {dimension_numbers = #tpu.dot_dimension_numbers<[1], [1], [0], [0], [0, 0, 1, 0], [], []>} : vector<1x128xf32>, vector<16x128xf32>, vector<1x16xf32> -> vector<1x16xf32>
    %14 = vector.broadcast %11 : vector<16x1xf32> to vector<16x16xf32>
    %15 = vector.broadcast %13 : vector<1x16xf32> to vector<16x16xf32>
    %16 = arith.addf %14, %15 : vector<16x16xf32>
    %cst_16 = arith.constant 0.000000e+00 : f32
    %17 = vector.broadcast %cst_16 : f32 to vector<16x16xf32>
    %18 = arith.cmpf oge, %16, %17 : vector<16x16xf32>
    %cst_17 = arith.constant 0.00999999977 : f32
    %19 = vector.broadcast %cst_17 : f32 to vector<16x16xf32>
    %20 = arith.mulf %19, %16 : vector<16x16xf32>
    %21 = arith.select %18, %16, %20 : vector<16x16xi1>, vector<16x16xf32>
    %c0_18 = arith.constant 0 : index
    %c0_19 = arith.constant 0 : index
    %22 = vector.load %arg0[%c0_18, %c0_19] : memref<16x16xf32, #tpu.memory_space<vmem>>, vector<16x16xf32>
    %23 = arith.addf %21, %22 : vector<16x16xf32>
    %cst_20 = arith.constant dense<0xFF800000> : vector<16xf32>
    %24 = vector.multi_reduction <maximumf>, %23, %cst_20 [1] : vector<16x16xf32> to vector<16xf32>
    %25 = vector.shape_cast %24 : vector<16xf32> to vector<16x1xf32>
    %26 = vector.broadcast %25 : vector<16x1xf32> to vector<16x16xf32>
    %27 = arith.subf %23, %26 : vector<16x16xf32>
    %28 = math.exp %27 : vector<16x16xf32>
    %cst_21 = arith.constant dense<0.000000e+00> : vector<16xf32>
    %29 = vector.multi_reduction <add>, %28, %cst_21 [1] : vector<16x16xf32> to vector<16xf32>
    %30 = vector.shape_cast %29 : vector<16xf32> to vector<16x1xf32>
    %31 = tpu.reciprocal %30 {approx = true} : vector<16x1xf32> -> vector<16x1xf32>
    %32 = vector.broadcast %31 : vector<16x1xf32> to vector<16x16xf32>
    %33 = arith.mulf %28, %32 : vector<16x16xf32>
    %cst_22 = arith.constant dense<0.000000e+00> : vector<16x128xf32>
    %34 = tpu.matmul %33, %9, %cst_22 {dimension_numbers = #tpu.dot_dimension_numbers<[1], [0], [0], [1], [0, 0, 1, 1], [], []>} : vector<16x16xf32>, vector<16x128xf32>, vector<16x128xf32> -> vector<16x128xf32>
    %cst_23 = arith.constant 0.000000e+00 : f32
    %35 = vector.broadcast %cst_23 : f32 to vector<16x128xf32>
    %36 = arith.maximumf %34, %35 : vector<16x128xf32>
    %c0_24 = arith.constant 0 : index
    %c0_25 = arith.constant 0 : index
    %37 = vector.load %arg8[%c0_24, %c0_25] : memref<16x128xf32, #tpu.memory_space<vmem>>, vector<16x128xf32>
    tpu.vector_store %arg8[%c0_24, %c0_25], %36 {strides = array<i32>} : memref<16x128xf32, #tpu.memory_space<vmem>>, vector<16x128xf32>,
    return
  }
}

</mosaic_0001>

<bundles_post_ra>
// kernel: graph_unet_forward.7
= control target key start
LH: loop header
LB: loop body
LE: loop exit
PB: predicated region body
PF: predicated region fallthrough
CT: control target
= control target key end

     0   :  { %v565_v34 = vmov 0.0   ;;  %vm566_vm0 = vmmov 0   ;;  %v567_v41 = vmov 0   ;;  %v295_v46 = vlaneseq  ;;  %s729_s2 = inlined_call_operand.vmem [shape: f32[128,128], index: 2, kind: input, shape index: {}]   ;;  %s730_s1 = inlined_call_operand.vmem [shape: f32[16,128], index: 1, kind: input, shape index: {}]   ;;  %s731_s4 = inlined_call_operand.vmem [shape: f32[128,1], index: 4, kind: input, shape index: {}]   ;;  %s732_s3 = inlined_call_operand.vmem [shape: f32[1,128], index: 3, kind: input, shape index: {}]   ;;  %s733_s5 = inlined_call_operand.vmem [shape: f32[1,128], index: 5, kind: input, shape index: {}]   ;;  %s734_s0 = inlined_call_operand.vmem [shape: f32[16,16], index: 0, kind: input, shape index: {}]   ;;  %s735_s6 = inlined_call_operand.vmem [shape: f32[16,128], index: 6, kind: output, shape index: {}]  }
   0x1   :  { %v40_v0 = vld [vmem:[%s729_s2 + $0x78] sm:$0xff]  ;;  %v39_v1 = vld [vmem:[%s729_s2 + $0x70] sm:$0xff]  ;;  %v38_v2 = vld [vmem:[%s729_s2 + $0x68] sm:$0xff]  ;;  %556 = vset.pattern.permute.xlu0 %v567_v41  ;;  %vm311_vm2 = vcmask 130048  }
   0x2   :  { %469 = vmatprep.subr.mxu0 %v40_v0  ;;  %v37_v3 = vld [vmem:[%s729_s2 + $0x60] sm:$0xff]  ;;  %v36_v5 = vld [vmem:[%s729_s2 + $0x58] sm:$0xff]  ;;  %v137_v7 = vld [vmem:[%s731_s4 + $0x70] sm:$0xff]  ;;  %v296_v47 = vshrl.u32 %v295_v46, 7 }
   0x3   :  { %470 = vmatpush3.msra.mxu0 %v40_v0  ;;  %v23_v4 = vld [vmem:[%s730_s1] sm:$0xff]  ;;  %v138_v6 = vld [vmem:[%s731_s4 + $0x78] sm:$0xff]  ;;  %v35_v8 = vld [vmem:[%s729_s2 + $0x50] sm:$0xff] }
   0x4   :  { %471 = vmatprep.subr.mxu0 %v39_v1  ;;  %501 = vmatprep.mubr.f32.mxu0 %v23_v4  ;;  %v136_v9 = vld [vmem:[%s731_s4 + $0x68] sm:$0xff]  ;;  %v135_v11 = vld [vmem:[%s731_s4 + $0x60] sm:$0xff]  ;;  %v134_v13 = vld [vmem:[%s731_s4 + $0x58] sm:$0xff]  ;;  %v297_v48 = vsub.s32 0, %v296_v47 }
   0x5   :  { %472 = vmatpush3.msra.mxu0 %v39_v1  ;;  %504 = vmatprep.subr.mxu1 %v138_v6  ;;  %v34_v10 = vld [vmem:[%s729_s2 + $0x48] sm:$0xff]  ;;  %v33_v12 = vld [vmem:[%s729_s2 + $0x40] sm:$0xff]  ;;  %v32_v14 = vld [vmem:[%s729_s2 + $0x38] sm:$0xff] }
   0x6   :  { %473 = vmatprep.subr.mxu0 %v38_v2  ;;  %505 = vmatpush3.msra.mxu1 %v138_v6  ;;  %v133_v15 = vld [vmem:[%s731_s4 + $0x50] sm:$0xff]  ;;  %v132_v17 = vld [vmem:[%s731_s4 + $0x48] sm:$0xff]  ;;  %v131_v19 = vld [vmem:[%s731_s4 + $0x40] sm:$0xff] }
   0x7   :  { %474 = vmatpush3.msra.mxu0 %v38_v2  ;;  %506 = vmatprep.subr.mxu1 %v137_v7  ;;  %v31_v16 = vld [vmem:[%s729_s2 + $0x30] sm:$0xff]  ;;  %v30_v18 = vld [vmem:[%s729_s2 + $0x28] sm:$0xff]  ;;  %v29_v20 = vld [vmem:[%s729_s2 + $0x20] sm:$0xff] }
   0x8   :  { %475 = vmatprep.subr.mxu0 %v37_v3  ;;  %507 = vmatpush3.msra.mxu1 %v137_v7  ;;  %v130_v21 = vld [vmem:[%s731_s4 + $0x38] sm:$0xff]  ;;  %v129_v23 = vld [vmem:[%s731_s4 + $0x30] sm:$0xff]  ;;  %v128_v25 = vld [vmem:[%s731_s4 + $0x28] sm:$0xff] }
   0x9   :  { %476 = vmatpush3.msra.mxu0 %v37_v3  ;;  %508 = vmatprep.subr.mxu1 %v136_v9  ;;  %v28_v22 = vld [vmem:[%s729_s2 + $0x18] sm:$0xff]  ;;  %v27_v24 = vld [vmem:[%s729_s2 + $0x10] sm:$0xff]  ;;  %v26_v26 = vld [vmem:[%s729_s2 + $0x8] sm:$0xff] }
   0xa   :  { %477 = vmatprep.subr.mxu0 %v36_v5  ;;  %509 = vmatpush3.msra.mxu1 %v136_v9  ;;  %v127_v27 = vld [vmem:[%s731_s4 + $0x20] sm:$0xff]  ;;  %v126_v29 = vld [vmem:[%s731_s4 + $0x18] sm:$0xff]  ;;  %v24_v30 = vld [vmem:[%s730_s1 + $0x8] sm:$0xff] }
   0xb   :  { %478 = vmatpush3.msra.mxu0 %v36_v5  ;;  %510 = vmatprep.subr.mxu1 %v135_v11  ;;  %v25_v28 = vld [vmem:[%s729_s2] sm:$0xff]  ;;  %v125_v31 = vld [vmem:[%s731_s4 + $0x10] sm:$0xff]  ;;  %v124_v32 = vld [vmem:[%s731_s4 + $0x8] sm:$0xff] }
   0xc   :  { %479 = vmatprep.subr.mxu0 %v35_v8  ;;  %511 = vmatpush3.msra.mxu1 %v135_v11  ;;  %v123_v33 = vld [vmem:[%s731_s4] sm:$0xff]  ;;  %v308_v59 = vld [vmem:[%s734_s0 + $0x8] sm:$0xff] }
   0xd   :  { %480 = vmatpush3.msra.mxu0 %v35_v8  ;;  %512 = vmatprep.subr.mxu1 %v134_v13  ;;  %v423_v35 = vld [vmem:[%s732_s3] ss:$0 sm:$0xff] }
   0xe   :  { %481 = vmatprep.subr.mxu0 %v34_v10  ;;  %513 = vmatpush3.msra.mxu1 %v134_v13  ;;  %v214_v40 = vld [vmem:[%s733_s5] sm:$0x1] }
   0xf   :  { %482 = vmatpush3.msra.mxu0 %v34_v10  ;;  %514 = vmatprep.subr.mxu1 %v133_v15  ;;  %v307_v53 = vld [vmem:[%s734_s0] sm:$0xff] }
  0x10   :  { %483 = vmatprep.subr.mxu0 %v33_v12  ;;  %515 = vmatpush3.msra.mxu1 %v133_v15 }
  0x11   :  { %484 = vmatpush3.msra.mxu0 %v33_v12  ;;  %516 = vmatprep.subr.mxu1 %v132_v17 }
  0x12   :  { %485 = vmatprep.subr.mxu0 %v32_v14  ;;  %517 = vmatpush3.msra.mxu1 %v132_v17 }
  0x13   :  { %486 = vmatpush3.msra.mxu0 %v32_v14  ;;  %518 = vmatprep.subr.mxu1 %v131_v19 }
  0x14   :  { %487 = vmatprep.subr.mxu0 %v31_v16  ;;  %519 = vmatpush3.msra.mxu1 %v131_v19 }
  0x15   :  { %488 = vmatpush3.msra.mxu0 %v31_v16  ;;  %520 = vmatprep.subr.mxu1 %v130_v21 }
  0x16   :  { %489 = vmatprep.subr.mxu0 %v30_v18  ;;  %521 = vmatpush3.msra.mxu1 %v130_v21 }
  0x17   :  { %490 = vmatpush3.msra.mxu0 %v30_v18  ;;  %522 = vmatprep.subr.mxu1 %v129_v23 }
  0x18   :  { %491 = vmatprep.subr.mxu0 %v29_v20  ;;  %523 = vmatpush3.msra.mxu1 %v129_v23 }
  0x19   :  { %492 = vmatpush3.msra.mxu0 %v29_v20  ;;  %524 = vmatprep.subr.mxu1 %v128_v25 }
  0x1a   :  { %493 = vmatprep.subr.mxu0 %v28_v22  ;;  %525 = vmatpush3.msra.mxu1 %v128_v25 }
  0x1b   :  { %494 = vmatpush3.msra.mxu0 %v28_v22  ;;  %526 = vmatprep.subr.mxu1 %v127_v27 }
  0x1c   :  { %495 = vmatprep.subr.mxu0 %v27_v24  ;;  %527 = vmatpush3.msra.mxu1 %v127_v27 }
  0x1d   :  { %496 = vmatpush3.msra.mxu0 %v27_v24  ;;  %528 = vmatprep.subr.mxu1 %v126_v29 }
  0x1e   :  { %497 = vmatprep.subr.mxu0 %v26_v26  ;;  %529 = vmatpush3.msra.mxu1 %v126_v29 }
  0x1f   :  { %498 = vmatpush3.msra.mxu0 %v26_v26  ;;  %530 = vmatprep.subr.mxu1 %v125_v31 }
  0x20   :  { %499 = vmatprep.subr.mxu0 %v25_v28  ;;  %531 = vmatpush3.msra.mxu1 %v125_v31 }
  0x21   :  { %500 = vmatpush3.msra.mxu0 %v25_v28  ;;  %532 = vmatprep.subr.mxu1 %v124_v32 }
  0x22   :  { %502 = vmatmul.mubr.f32.vlgmr.msra.gmra.mxu0 %v24_v30  ;;  %533 = vmatpush3.msra.mxu1 %v124_v32 }
  0x23   :  { %534 = vmatprep.subr.mxu1 %v123_v33  ;;  %539 = vmatprep.subr.mxu0 %v565_v34 }
  0x24   :  { %535 = vmatpush3.msra.mxu1 %v123_v33  ;;  %543 = vmatprep.mubr.msk.f32.mxu0 %vm566_vm0, %v565_v34 }
  0xe2   :  { %v503_v36 = vpop.f32.mrf.mxu0 }
  0xe3   :  { %v120_v37 = vadd.f32 %v503_v36, %v423_v35 }
  0xe4   :  { %v114_v38 = vpop.f32.mrf.mxu0 }
  0xe5   :  { %v115_v39 = vadd.f32 %v423_v35, %v114_v38  ;;  %540 = vmatpush3.xpose.msra.mxu0 %v120_v37  ;;  %546 = vmatprep.subr.mxu1 %v120_v37 }
  0xe6   :  { %541 = vmatprep.subr.mxu0 %v565_v34 }
  0xe7   :  { %536 = vmatprep.mubr.f32.mxu1 %v115_v39 }
  0xe8   :  { %537 = vmatmul.mubr.f32.vlgmr.msra.gmra.mxu1 %v120_v37 }
  0xe9   :  { %547 = vmatpush3.msra.mxu1 %v120_v37  ;;  %542 = vmatpush3.xpose.msra.mxu0 %v115_v39 }
  0xea   :  { %548 = vmatprep.subr.mxu1 %v115_v39 }
  0xeb   :  { %549 = vmatpush3.msra.mxu1 %v115_v39 }
  0xec   :  { %544 = vmatmul.mubr.f32.vlgmr.msra.gmra.mxu0 %v214_v40 }
 0x1a8   :  { %v538_v42 = vpop.f32.mrf.mxu1 }
 0x1aa   :  { %v205_v43 = vpop.f32.mrf.mxu1 }
 0x1ab   :  { %287 = vperm.xlu0 %556, %v205_v43  }
 0x1ac   :  { %v281_v44 = vpop.f32.mrf.mxu0 }
 0x1ad   :  { %v298_v49 = vrot.slane %v281_v44, %v297_v48 }
 0x1ae   :  { %v545_v45 = vpop.f32.mrf.mxu0 }
 0x1af   :  { %292 = vperm.xlu0 %556, %v538_v42  }
 0x226   :  { %v288_v50 = vpop.permute.xlu0 %287 }
 0x227   :  { %v299_v51 = vadd.f32 %v298_v49, %v288_v50 }
 0x229   :  { %v303_v52 = vmul.f32 0.01, %v299_v51  ;;  %vm301_vm1 = vcmp.ge.f32.partialorder %v299_v51, 0.0 }
 0x22a   :  { %v293_v54 = vpop.permute.xlu0 %292 }
 0x22b   :  { %v300_v55 = vadd.f32 %v298_v49, %v293_v54  ;;  %v305_v56 = vsel %vm301_vm1, %v299_v51, %v303_v52 }
 0x22c   :  { %v309_v57 = vadd.f32 %v307_v53, %v305_v56 }
 0x22d   :  { %vm302_vm3 = vcmp.ge.f32.partialorder %v300_v55, 0.0  ;;  %v304_v58 = vmul.f32 0.01, %v300_v55 }
 0x22e   :  { %v312_v60 = vsel %vm311_vm2, %v309_v57, -inf }
 0x22f   :  { %313 = vmax.xlane.f32.xlu1 %v312_v60  ;;  %v306_v61 = vsel %vm302_vm3, %v300_v55, %v304_v58 }
 0x230   :  { %v310_v62 = vadd.f32 %v308_v59, %v306_v61 }
 0x232   :  { %v315_v63 = vsel %vm311_vm2, %v310_v62, -inf }
 0x233   :  { %316 = vmax.xlane.f32.xlu1 %v315_v63 }
 0x2b8   :  { %v314_v0 = vpop.xlane.xlu1 %313 }
 0x2b9   :  { %v318_v1 = vsub.f32 %v309_v57, %v314_v0 }
 0x2bb   :  { %v320_v2 = vmul.f32 1.442695, %v318_v1 }
 0x2bc   :  { %v317_v3 = vpop.xlane.xlu1 %316 }
 0x2bd   :  { %557 = vpow2.f32 %v320_v2  ;;  %v319_v4 = vsub.f32 %v310_v62, %v317_v3 }
 0x2bf   :  { %v322_v5 = vmul.f32 1.442695, %v319_v4 }
 0x2c1   :  { %559 = vpow2.f32 %v322_v5 }
 0x2ca   :  { %v558_v6 = vpop.eup %557 }
 0x2cb   :  { %v324_v7 = vsel %vm311_vm2, %v558_v6, 0.0 }
 0x2cc   :  { %325 = vadd.xlane.f32.xlu0 %v324_v7 }
 0x2ce   :  { %v560_v8 = vpop.eup %559 }
 0x2cf   :  { %v327_v9 = vsel %vm311_vm2, %v560_v8, 0.0 }
 0x2d0   :  { %328 = vadd.xlane.f32.xlu1 %v327_v9 }
 0x355   :  { %v326_v10 = vpop.xlane.xlu0 %325 }
 0x356   :  { %561 = vrcp.f32 %v326_v10 }
 0x359   :  { %v329_v11 = vpop.xlane.xlu1 %328 }
 0x35a   :  { %563 = vrcp.f32 %v329_v11 }
 0x363   :  { %v562_v12 = vpop.eup %561 }
 0x364   :  { %v332_v13 = vmul.f32 %v562_v12, %v558_v6 }
 0x366   :  { %550 = vmatprep.mubr.msk.f32.mxu1 %vm311_vm2, %v332_v13 }
 0x367   :  { %v564_v14 = vpop.eup %563 }
 0x368   :  { %v333_v15 = vmul.f32 %v564_v14, %v560_v8 }
 0x36a   :  { %551 = vmatmul.mubr.msk.f32.vlgmr.msra.gmra.mxu1 %vm311_vm2, %v333_v15 }
 0x42a   :  { %v552_v16 = vpop.f32.mrf.mxu1 }
 0x42b   :  { %v416_v17 = vmax.f32 %v552_v16, 0.0 }
 0x42c   :  { %v406_v18 = vpop.f32.mrf.mxu1 }
 0x42d   :  { %418 = vst [vmem:[%s735_s6 + $0x8] sm:$0xff] %v416_v17  ;;  %v415_v19 = vmax.f32 %v406_v18, 0.0 }
 0x42f   :  { %417 = vst [vmem:[%s735_s6] sm:$0xff] %v415_v19 }

// kernel: graph_unet_forward.9
= control target key start
LH: loop header
LB: loop body
LE: loop exit
PB: predicated region body
PF: predicated region fallthrough
CT: control target
= control target key end

     0   :  { %v571_v34 = vmov 0.0   ;;  %vm572_vm0 = vmmov 0   ;;  %vm341_vm1 = vcmask 1043456   ;;  %v573_v41 = vmov 0   ;;  %s735_s2 = inlined_call_operand.vmem [shape: f32[128,128], index: 2, kind: input, shape index: {}]   ;;  %s736_s1 = inlined_call_operand.vmem [shape: f32[12,128], index: 1, kind: input, shape index: {}]   ;;  %s737_s4 = inlined_call_operand.vmem [shape: f32[128,1], index: 4, kind: input, shape index: {}]   ;;  %s738_s3 = inlined_call_operand.vmem [shape: f32[1,128], index: 3, kind: input, shape index: {}]   ;;  %s739_s5 = inlined_call_operand.vmem [shape: f32[1,128], index: 5, kind: input, shape index: {}]   ;;  %s740_s0 = inlined_call_operand.vmem [shape: f32[12,12], index: 0, kind: input, shape index: {}]   ;;  %s741_s6 = inlined_call_operand.vmem [shape: f32[12,128], index: 6, kind: output, shape index: {}]  }
   0x1   :  { %v40_v0 = vld [vmem:[%s735_s2 + $0x78] sm:$0xff]  ;;  %v39_v1 = vld [vmem:[%s735_s2 + $0x70] sm:$0xff]  ;;  %v38_v2 = vld [vmem:[%s735_s2 + $0x68] sm:$0xff]  ;;  %562 = vset.pattern.permute.xlu0 %v573_v41  ;;  %v295_v46 = vlaneseq  ;;  %vm311_vm3 = vcmask 97280   ;;  %vm315_vm5 = vcmask 93184  }
   0x2   :  { %475 = vmatprep.subr.mxu0 %v40_v0  ;;  %v37_v3 = vld [vmem:[%s735_s2 + $0x60] sm:$0xff]  ;;  %v36_v5 = vld [vmem:[%s735_s2 + $0x58] sm:$0xff]  ;;  %v137_v7 = vld [vmem:[%s737_s4 + $0x70] sm:$0xff] }
   0x3   :  { %476 = vmatpush3.msra.mxu0 %v40_v0  ;;  %v23_v4 = vld [vmem:[%s736_s1] sm:$0xff]  ;;  %v138_v6 = vld [vmem:[%s737_s4 + $0x78] sm:$0xff]  ;;  %v35_v8 = vld [vmem:[%s735_s2 + $0x50] sm:$0xff]  ;;  %v296_v47 = vshrl.u32 %v295_v46, 7 }
   0x4   :  { %477 = vmatprep.subr.mxu0 %v39_v1  ;;  %507 = vmatprep.mubr.f32.mxu0 %v23_v4  ;;  %v136_v9 = vld [vmem:[%s737_s4 + $0x68] sm:$0xff]  ;;  %v135_v11 = vld [vmem:[%s737_s4 + $0x60] sm:$0xff]  ;;  %v134_v13 = vld [vmem:[%s737_s4 + $0x58] sm:$0xff] }
   0x5   :  { %478 = vmatpush3.msra.mxu0 %v39_v1  ;;  %510 = vmatprep.subr.mxu1 %v138_v6  ;;  %v34_v10 = vld [vmem:[%s735_s2 + $0x48] sm:$0xff]  ;;  %v33_v12 = vld [vmem:[%s735_s2 + $0x40] sm:$0xff]  ;;  %v32_v14 = vld [vmem:[%s735_s2 + $0x38] sm:$0xff]  ;;  %v297_v48 = vsub.s32 0, %v296_v47 }
   0x6   :  { %479 = vmatprep.subr.mxu0 %v38_v2  ;;  %511 = vmatpush3.msra.mxu1 %v138_v6  ;;  %v133_v15 = vld [vmem:[%s737_s4 + $0x50] sm:$0xff]  ;;  %v132_v17 = vld [vmem:[%s737_s4 + $0x48] sm:$0xff]  ;;  %v131_v19 = vld [vmem:[%s737_s4 + $0x40] sm:$0xff] }
   0x7   :  { %480 = vmatpush3.msra.mxu0 %v38_v2  ;;  %512 = vmatprep.subr.mxu1 %v137_v7  ;;  %v31_v16 = vld [vmem:[%s735_s2 + $0x30] sm:$0xff]  ;;  %v30_v18 = vld [vmem:[%s735_s2 + $0x28] sm:$0xff]  ;;  %v29_v20 = vld [vmem:[%s735_s2 + $0x20] sm:$0xff] }
   0x8   :  { %481 = vmatprep.subr.mxu0 %v37_v3  ;;  %513 = vmatpush3.msra.mxu1 %v137_v7  ;;  %v130_v21 = vld [vmem:[%s737_s4 + $0x38] sm:$0xff]  ;;  %v129_v23 = vld [vmem:[%s737_s4 + $0x30] sm:$0xff]  ;;  %v128_v25 = vld [vmem:[%s737_s4 + $0x28] sm:$0xff] }
   0x9   :  { %482 = vmatpush3.msra.mxu0 %v37_v3  ;;  %514 = vmatprep.subr.mxu1 %v136_v9  ;;  %v28_v22 = vld [vmem:[%s735_s2 + $0x18] sm:$0xff]  ;;  %v27_v24 = vld [vmem:[%s735_s2 + $0x10] sm:$0xff]  ;;  %v26_v26 = vld [vmem:[%s735_s2 + $0x8] sm:$0xff] }
   0xa   :  { %483 = vmatprep.subr.mxu0 %v36_v5  ;;  %515 = vmatpush3.msra.mxu1 %v136_v9  ;;  %v127_v27 = vld [vmem:[%s737_s4 + $0x20] sm:$0xff]  ;;  %v126_v29 = vld [vmem:[%s737_s4 + $0x18] sm:$0xff]  ;;  %v24_v30 = vld [vmem:[%s736_s1 + $0x8] sm:$0xf] }
   0xb   :  { %484 = vmatpush3.msra.mxu0 %v36_v5  ;;  %516 = vmatprep.subr.mxu1 %v135_v11  ;;  %v25_v28 = vld [vmem:[%s735_s2] sm:$0xff]  ;;  %v125_v31 = vld [vmem:[%s737_s4 + $0x10] sm:$0xff]  ;;  %v124_v32 = vld [vmem:[%s737_s4 + $0x8] sm:$0xff] }
   0xc   :  { %485 = vmatprep.subr.mxu0 %v35_v8  ;;  %517 = vmatpush3.msra.mxu1 %v135_v11  ;;  %v123_v33 = vld [vmem:[%s737_s4] sm:$0xff]  ;;  %v308_v59 = vld [vmem:[%s740_s0 + $0x8] sm:$0xf] }
   0xd   :  { %486 = vmatpush3.msra.mxu0 %v35_v8  ;;  %518 = vmatprep.subr.mxu1 %v134_v13  ;;  %v428_v35 = vld [vmem:[%s738_s3] ss:$0 sm:$0xff] }
   0xe   :  { %487 = vmatprep.subr.mxu0 %v34_v10  ;;  %519 = vmatpush3.msra.mxu1 %v134_v13  ;;  %v214_v40 = vld [vmem:[%s739_s5] sm:$0x1] }
   0xf   :  { %488 = vmatpush3.msra.mxu0 %v34_v10  ;;  %520 = vmatprep.subr.mxu1 %v133_v15  ;;  %v307_v53 = vld [vmem:[%s740_s0] sm:$0xff] }
  0x10   :  { %489 = vmatprep.subr.mxu0 %v33_v12  ;;  %521 = vmatpush3.msra.mxu1 %v133_v15 }
  0x11   :  { %490 = vmatpush3.msra.mxu0 %v33_v12  ;;  %522 = vmatprep.subr.mxu1 %v132_v17 }
  0x12   :  { %491 = vmatprep.subr.mxu0 %v32_v14  ;;  %523 = vmatpush3.msra.mxu1 %v132_v17 }
  0x13   :  { %492 = vmatpush3.msra.mxu0 %v32_v14  ;;  %524 = vmatprep.subr.mxu1 %v131_v19 }
  0x14   :  { %493 = vmatprep.subr.mxu0 %v31_v16  ;;  %525 = vmatpush3.msra.mxu1 %v131_v19 }
  0x15   :  { %494 = vmatpush3.msra.mxu0 %v31_v16  ;;  %526 = vmatprep.subr.mxu1 %v130_v21 }
  0x16   :  { %495 = vmatprep.subr.mxu0 %v30_v18  ;;  %527 = vmatpush3.msra.mxu1 %v130_v21 }
  0x17   :  { %496 = vmatpush3.msra.mxu0 %v30_v18  ;;  %528 = vmatprep.subr.mxu1 %v129_v23 }
  0x18   :  { %497 = vmatprep.subr.mxu0 %v29_v20  ;;  %529 = vmatpush3.msra.mxu1 %v129_v23 }
  0x19   :  { %498 = vmatpush3.msra.mxu0 %v29_v20  ;;  %530 = vmatprep.subr.mxu1 %v128_v25 }
  0x1a   :  { %499 = vmatprep.subr.mxu0 %v28_v22  ;;  %531 = vmatpush3.msra.mxu1 %v128_v25 }
  0x1b   :  { %500 = vmatpush3.msra.mxu0 %v28_v22  ;;  %532 = vmatprep.subr.mxu1 %v127_v27 }
  0x1c   :  { %501 = vmatprep.subr.mxu0 %v27_v24  ;;  %533 = vmatpush3.msra.mxu1 %v127_v27 }
  0x1d   :  { %502 = vmatpush3.msra.mxu0 %v27_v24  ;;  %534 = vmatprep.subr.mxu1 %v126_v29 }
  0x1e   :  { %503 = vmatprep.subr.mxu0 %v26_v26  ;;  %535 = vmatpush3.msra.mxu1 %v126_v29 }
  0x1f   :  { %504 = vmatpush3.msra.mxu0 %v26_v26  ;;  %536 = vmatprep.subr.mxu1 %v125_v31 }
  0x20   :  { %505 = vmatprep.subr.mxu0 %v25_v28  ;;  %537 = vmatpush3.msra.mxu1 %v125_v31 }
  0x21   :  { %506 = vmatpush3.msra.mxu0 %v25_v28  ;;  %538 = vmatprep.subr.mxu1 %v124_v32 }
  0x22   :  { %508 = vmatmul.mubr.f32.vlgmr.msra.gmra.mxu0 %v24_v30  ;;  %539 = vmatpush3.msra.mxu1 %v124_v32 }
  0x23   :  { %540 = vmatprep.subr.mxu1 %v123_v33  ;;  %545 = vmatprep.subr.mxu0 %v571_v34 }
  0x24   :  { %541 = vmatpush3.msra.mxu1 %v123_v33  ;;  %549 = vmatprep.mubr.msk.f32.mxu0 %vm572_vm0, %v571_v34 }
  0xe2   :  { %v509_v36 = vpop.f32.mrf.mxu0 }
  0xe3   :  { %v120_v37 = vadd.f32 %v509_v36, %v428_v35 }
  0xe4   :  { %v114_v38 = vpop.f32.mrf.mxu0 }
  0xe5   :  { %v115_v39 = vadd.f32 %v428_v35, %v114_v38  ;;  %546 = vmatpush3.xpose.msra.mxu0 %v120_v37  ;;  %552 = vmatprep.subr.msk.mxu1 %vm341_vm1, %v120_v37 }
  0xe6   :  { %547 = vmatprep.subr.mxu0 %v571_v34 }
  0xe7   :  { %542 = vmatprep.mubr.f32.mxu1 %v115_v39 }
  0xe8   :  { %543 = vmatmul.mubr.f32.vlgmr.msra.gmra.mxu1 %v120_v37 }
  0xe9   :  { %553 = vmatpush3.msk.msra.mxu1 %vm341_vm1, %v120_v37  ;;  %548 = vmatpush3.xpose.msra.mxu0 %v115_v39 }
  0xea   :  { %554 = vmatprep.subr.mxu1 %v115_v39 }
  0xeb   :  { %555 = vmatpush3.msra.mxu1 %v115_v39 }
  0xec   :  { %550 = vmatmul.mubr.f32.vlgmr.msra.gmra.mxu0 %v214_v40 }
 0x1a8   :  { %v544_v42 = vpop.f32.mrf.mxu1 }
 0x1aa   :  { %v205_v43 = vpop.f32.mrf.mxu1 }
 0x1ab   :  { %287 = vperm.xlu0 %562, %v205_v43  }
 0x1ac   :  { %v281_v44 = vpop.f32.mrf.mxu0 }
 0x1ad   :  { %v298_v49 = vrot.slane %v281_v44, %v297_v48 }
 0x1ae   :  { %v551_v45 = vpop.f32.mrf.mxu0 }
 0x1af   :  { %292 = vperm.xlu0 %562, %v544_v42  }
 0x226   :  { %v288_v50 = vpop.permute.xlu0 %287 }
 0x227   :  { %v299_v51 = vadd.f32 %v298_v49, %v288_v50 }
 0x229   :  { %v303_v52 = vmul.f32 0.01, %v299_v51  ;;  %vm301_vm2 = vcmp.ge.f32.partialorder %v299_v51, 0.0 }
 0x22a   :  { %v293_v54 = vpop.permute.xlu0 %292 }
 0x22b   :  { %v300_v55 = vadd.f32 %v298_v49, %v293_v54  ;;  %v305_v56 = vsel %vm301_vm2, %v299_v51, %v303_v52 }
 0x22c   :  { %v309_v57 = vadd.f32 %v307_v53, %v305_v56 }
 0x22d   :  { %vm302_vm4 = vcmp.ge.f32.partialorder %v300_v55, 0.0  ;;  %v304_v58 = vmul.f32 0.01, %v300_v55 }
 0x22e   :  { %v312_v60 = vsel %vm311_vm3, %v309_v57, -inf }
 0x22f   :  { %313 = vmax.xlane.f32.xlu1 %v312_v60  ;;  %v306_v61 = vsel %vm302_vm4, %v300_v55, %v304_v58 }
 0x230   :  { %v310_v62 = vadd.f32 %v308_v59, %v306_v61 }
 0x232   :  { %v316_v63 = vsel %vm315_vm5, %v310_v62, -inf }
 0x233   :  { %317 = vmax.xlane.f32.xlu1 %v316_v63 }
 0x2b8   :  { %v314_v0 = vpop.xlane.xlu1 %313 }
 0x2b9   :  { %v319_v1 = vsub.f32 %v309_v57, %v314_v0 }
 0x2bb   :  { %v321_v2 = vmul.f32 1.442695, %v319_v1 }
 0x2bc   :  { %v318_v3 = vpop.xlane.xlu1 %317 }
 0x2bd   :  { %563 = vpow2.f32 %v321_v2  ;;  %v320_v4 = vsub.f32 %v310_v62, %v318_v3 }
 0x2bf   :  { %v323_v5 = vmul.f32 1.442695, %v320_v4 }
 0x2c1   :  { %565 = vpow2.f32 %v323_v5 }
 0x2ca   :  { %v564_v6 = vpop.eup %563 }
 0x2cb   :  { %v325_v7 = vsel %vm311_vm3, %v564_v6, 0.0 }
 0x2cc   :  { %326 = vadd.xlane.f32.xlu0 %v325_v7 }
 0x2ce   :  { %v566_v8 = vpop.eup %565 }
 0x2cf   :  { %v328_v9 = vsel %vm315_vm5, %v566_v8, 0.0 }
 0x2d0   :  { %329 = vadd.xlane.f32.xlu1 %v328_v9 }
 0x355   :  { %v327_v10 = vpop.xlane.xlu0 %326 }
 0x356   :  { %567 = vrcp.f32 %v327_v10 }
 0x359   :  { %v330_v11 = vpop.xlane.xlu1 %329 }
 0x35a   :  { %569 = vrcp.f32 %v330_v11 }
 0x363   :  { %v568_v12 = vpop.eup %567 }
 0x364   :  { %v333_v13 = vmul.f32 %v568_v12, %v564_v6 }
 0x366   :  { %556 = vmatprep.mubr.msk.f32.mxu1 %vm311_vm3, %v333_v13 }
 0x367   :  { %v570_v14 = vpop.eup %569 }
 0x368   :  { %v334_v15 = vmul.f32 %v570_v14, %v566_v8 }
 0x36a   :  { %557 = vmatmul.mubr.msk.f32.vlgmr.msra.gmra.mxu1 %vm311_vm3, %v334_v15 }
 0x42a   :  { %v558_v16 = vpop.f32.mrf.mxu1 }
 0x42b   :  { %v421_v17 = vmax.f32 %v558_v16, 0.0 }
 0x42c   :  { %v411_v18 = vpop.f32.mrf.mxu1 }
 0x42d   :  { %423 = vst [vmem:[%s741_s6 + $0x8] sm:$0xf] %v421_v17  ;;  %v420_v19 = vmax.f32 %v411_v18, 0.0 }
 0x42f   :  { %422 = vst [vmem:[%s741_s6] sm:$0xff] %v420_v19 }

// kernel: graph_unet_forward.10
= control target key start
LH: loop header
LB: loop body
LE: loop exit
PB: predicated region body
PF: predicated region fallthrough
CT: control target
= control target key end

     0   :  { %v514_v0 = vmov 0.0   ;;  %vm515_vm0 = vmmov 0   ;;  %v516_v34 = vmov 0   ;;  %vm305_vm1 = vcmask 1045504   ;;  %s705_s2 = inlined_call_operand.vmem [shape: f32[128,128], index: 2, kind: input, shape index: {}]   ;;  %s706_s4 = inlined_call_operand.vmem [shape: f32[128,1], index: 4, kind: input, shape index: {}]   ;;  %s707_s1 = inlined_call_operand.vmem [shape: f32[6,128], index: 1, kind: input, shape index: {}]   ;;  %s708_s3 = inlined_call_operand.vmem [shape: f32[1,128], index: 3, kind: input, shape index: {}]   ;;  %s709_s5 = inlined_call_operand.vmem [shape: f32[1,128], index: 5, kind: input, shape index: {}]   ;;  %s710_s0 = inlined_call_operand.vmem [shape: f32[6,6], index: 0, kind: input, shape index: {}]   ;;  %s711_s6 = inlined_call_operand.vmem [shape: f32[6,128], index: 6, kind: output, shape index: {}]  }
   0x1   :  { %426 = vmatprep.subr.mxu0 %v514_v0  ;;  %v39_v1 = vld [vmem:[%s705_s2 + $0x78] sm:$0xff]  ;;  %v38_v2 = vld [vmem:[%s705_s2 + $0x70] sm:$0xff]  ;;  %458 = vmatprep.mubr.msk.f32.mxu0 %vm515_vm0, %v514_v0  ;;  %v37_v3 = vld [vmem:[%s705_s2 + $0x68] sm:$0xff]  ;;  %v279_v44 = vlaneseq  ;;  %vm289_vm3 = vcmask 46080   ;;  %vm301_vm4 = vcmask 48128  }
   0x2   :  { %427 = vmatpush3.msra.mxu0 %v39_v1  ;;  %461 = vmatprep.subr.mxu1 %v514_v0  ;;  %v36_v4 = vld [vmem:[%s705_s2 + $0x60] sm:$0xff]  ;;  %v132_v5 = vld [vmem:[%s706_s4 + $0x78] sm:$0xff]  ;;  %v131_v7 = vld [vmem:[%s706_s4 + $0x70] sm:$0xff] }
   0x3   :  { %428 = vmatprep.subr.mxu0 %v514_v0  ;;  %493 = vmatprep.mubr.msk.f32.mxu1 %vm515_vm0, %v514_v0  ;;  %v35_v6 = vld [vmem:[%s705_s2 + $0x58] sm:$0xff]  ;;  %v130_v8 = vld [vmem:[%s706_s4 + $0x68] sm:$0xff]  ;;  %v34_v9 = vld [vmem:[%s705_s2 + $0x50] sm:$0xff]  ;;  %v280_v45 = vshrl.u32 %v279_v44, 7 }
   0x4   :  { %429 = vmatpush3.msra.mxu0 %v38_v2  ;;  %462 = vmatpush3.msra.mxu1 %v132_v5  ;;  %v129_v10 = vld [vmem:[%s706_s4 + $0x60] sm:$0xff]  ;;  %v33_v11 = vld [vmem:[%s705_s2 + $0x48] sm:$0xff]  ;;  %v128_v12 = vld [vmem:[%s706_s4 + $0x58] sm:$0xff] }
   0x5   :  { %430 = vmatprep.subr.mxu0 %v514_v0  ;;  %463 = vmatprep.subr.mxu1 %v514_v0  ;;  %v32_v13 = vld [vmem:[%s705_s2 + $0x40] sm:$0xff]  ;;  %v127_v14 = vld [vmem:[%s706_s4 + $0x50] sm:$0xff]  ;;  %v31_v15 = vld [vmem:[%s705_s2 + $0x38] sm:$0xff]  ;;  %v281_v46 = vsub.s32 0, %v280_v45 }
   0x6   :  { %431 = vmatpush3.msra.mxu0 %v37_v3  ;;  %464 = vmatpush3.msra.mxu1 %v131_v7  ;;  %v126_v16 = vld [vmem:[%s706_s4 + $0x48] sm:$0xff]  ;;  %v30_v17 = vld [vmem:[%s705_s2 + $0x30] sm:$0xff]  ;;  %v125_v18 = vld [vmem:[%s706_s4 + $0x40] sm:$0xff] }
   0x7   :  { %432 = vmatprep.subr.mxu0 %v514_v0  ;;  %465 = vmatprep.subr.mxu1 %v514_v0  ;;  %v29_v19 = vld [vmem:[%s705_s2 + $0x28] sm:$0xff]  ;;  %v124_v20 = vld [vmem:[%s706_s4 + $0x38] sm:$0xff]  ;;  %v28_v21 = vld [vmem:[%s705_s2 + $0x20] sm:$0xff] }
   0x8   :  { %433 = vmatpush3.msra.mxu0 %v36_v4  ;;  %466 = vmatpush3.msra.mxu1 %v130_v8  ;;  %v123_v22 = vld [vmem:[%s706_s4 + $0x30] sm:$0xff]  ;;  %v27_v23 = vld [vmem:[%s705_s2 + $0x18] sm:$0xff]  ;;  %v122_v24 = vld [vmem:[%s706_s4 + $0x28] sm:$0xff] }
   0x9   :  { %434 = vmatprep.subr.mxu0 %v514_v0  ;;  %467 = vmatprep.subr.mxu1 %v514_v0  ;;  %v26_v25 = vld [vmem:[%s705_s2 + $0x10] sm:$0xff]  ;;  %v121_v26 = vld [vmem:[%s706_s4 + $0x20] sm:$0xff]  ;;  %v25_v27 = vld [vmem:[%s705_s2 + $0x8] sm:$0xff] }
   0xa   :  { %435 = vmatpush3.msra.mxu0 %v35_v6  ;;  %468 = vmatpush3.msra.mxu1 %v129_v10  ;;  %v120_v28 = vld [vmem:[%s706_s4 + $0x18] sm:$0xff]  ;;  %v24_v29 = vld [vmem:[%s705_s2] sm:$0xff]  ;;  %v119_v31 = vld [vmem:[%s706_s4 + $0x10] sm:$0xff] }
   0xb   :  { %436 = vmatprep.subr.mxu0 %v514_v0  ;;  %469 = vmatprep.subr.mxu1 %v514_v0  ;;  %v23_v30 = vld [vmem:[%s707_s1] sm:$0x3f]  ;;  %v118_v32 = vld [vmem:[%s706_s4 + $0x8] sm:$0xff] }
   0xc   :  { %437 = vmatpush3.msra.mxu0 %v34_v9  ;;  %470 = vmatpush3.msra.mxu1 %v128_v12  ;;  %v117_v33 = vld [vmem:[%s706_s4] sm:$0xff] }
   0xd   :  { %438 = vmatprep.subr.mxu0 %v514_v0  ;;  %471 = vmatprep.subr.mxu1 %v514_v0  ;;  %v385_v35 = vld [vmem:[%s708_s3] ss:$0 sm:$0xff] }
   0xe   :  { %439 = vmatpush3.msra.mxu0 %v33_v11  ;;  %472 = vmatpush3.msra.mxu1 %v127_v14  ;;  %v203_v39 = vld [vmem:[%s709_s5] sm:$0x1] }
   0xf   :  { %440 = vmatprep.subr.mxu0 %v514_v0  ;;  %473 = vmatprep.subr.mxu1 %v514_v0  ;;  %v287_v51 = vld [vmem:[%s710_s0] sm:$0x3f] }
  0x10   :  { %441 = vmatpush3.msra.mxu0 %v32_v13  ;;  %474 = vmatpush3.msra.mxu1 %v126_v16 }
  0x11   :  { %442 = vmatprep.subr.mxu0 %v514_v0  ;;  %475 = vmatprep.subr.mxu1 %v514_v0 }
  0x12   :  { %443 = vmatpush3.msra.mxu0 %v31_v15  ;;  %476 = vmatpush3.msra.mxu1 %v125_v18 }
  0x13   :  { %444 = vmatprep.subr.mxu0 %v514_v0  ;;  %477 = vmatprep.subr.mxu1 %v514_v0 }
  0x14   :  { %445 = vmatpush3.msra.mxu0 %v30_v17  ;;  %478 = vmatpush3.msra.mxu1 %v124_v20 }
  0x15   :  { %446 = vmatprep.subr.mxu0 %v514_v0  ;;  %479 = vmatprep.subr.mxu1 %v514_v0 }
  0x16   :  { %447 = vmatpush3.msra.mxu0 %v29_v19  ;;  %480 = vmatpush3.msra.mxu1 %v123_v22 }
  0x17   :  { %448 = vmatprep.subr.mxu0 %v514_v0  ;;  %481 = vmatprep.subr.mxu1 %v514_v0 }
  0x18   :  { %449 = vmatpush3.msra.mxu0 %v28_v21  ;;  %482 = vmatpush3.msra.mxu1 %v122_v24 }
  0x19   :  { %450 = vmatprep.subr.mxu0 %v514_v0  ;;  %483 = vmatprep.subr.mxu1 %v514_v0 }
  0x1a   :  { %451 = vmatpush3.msra.mxu0 %v27_v23  ;;  %484 = vmatpush3.msra.mxu1 %v121_v26 }
  0x1b   :  { %452 = vmatprep.subr.mxu0 %v514_v0  ;;  %485 = vmatprep.subr.mxu1 %v514_v0 }
  0x1c   :  { %453 = vmatpush3.msra.mxu0 %v26_v25  ;;  %486 = vmatpush3.msra.mxu1 %v120_v28 }
  0x1d   :  { %454 = vmatprep.subr.mxu0 %v514_v0  ;;  %487 = vmatprep.subr.mxu1 %v514_v0 }
  0x1e   :  { %455 = vmatpush3.msra.mxu0 %v25_v27  ;;  %488 = vmatpush3.msra.mxu1 %v119_v31 }
  0x1f   :  { %456 = vmatprep.subr.mxu0 %v514_v0  ;;  %489 = vmatprep.subr.mxu1 %v514_v0 }
  0x20   :  { %457 = vmatpush3.msra.mxu0 %v24_v29  ;;  %490 = vmatpush3.msra.mxu1 %v118_v32 }
  0x21   :  { %459 = vmatmul.mubr.f32.vlgmr.msra.gmra.mxu0 %v23_v30  ;;  %496 = vmatprep.subr.mxu0 %v514_v0 }
  0x22   :  { %498 = vmatprep.mubr.msk.f32.mxu0 %vm515_vm0, %v514_v0  ;;  %491 = vmatprep.subr.mxu1 %v514_v0 }
  0x23   :  { %492 = vmatpush3.msra.mxu1 %v117_v33  ;;  %509 = vset.pattern.permute.xlu0 %v516_v34 }
  0x24   :  { %501 = vmatprep.subr.mxu1 %v514_v0 }
  0xe1   :  { %v113_v36 = vpop.f32.mrf.mxu0 }
  0xe2   :  { %v114_v37 = vadd.f32 %v385_v35, %v113_v36 }
  0xe3   :  { %v460_v38 = vpop.f32.mrf.mxu0 }
  0xe4   :  { %494 = vmatmul.mubr.f32.vlgmr.msra.gmra.mxu1 %v114_v37  ;;  %497 = vmatpush3.xpose.msra.mxu0 %v114_v37 }
  0xe5   :  { %502 = vmatpush3.msk.msra.mxu1 %vm305_vm1, %v114_v37  ;;  %503 = vmatprep.mubr.msk.f32.mxu1 %vm515_vm0, %v514_v0 }
  0xe7   :  { %499 = vmatmul.mubr.f32.vlgmr.msra.gmra.mxu0 %v203_v39 }
 0x1a4   :  { %v199_v40 = vpop.f32.mrf.mxu1 }
 0x1a5   :  { %276 = vperm.xlu0 %509, %v199_v40  }
 0x1a6   :  { %v495_v41 = vpop.f32.mrf.mxu1 }
 0x1a7   :  { %v270_v42 = vpop.f32.mrf.mxu0 }
 0x1a8   :  { %v282_v47 = vrot.slane %v270_v42, %v281_v46 }
 0x1a9   :  { %v500_v43 = vpop.f32.mrf.mxu0 }
 0x220   :  { %v277_v48 = vpop.permute.xlu0 %276 }
 0x221   :  { %v283_v49 = vadd.f32 %v282_v47, %v277_v48 }
 0x223   :  { %vm284_vm2 = vcmp.ge.f32.partialorder %v283_v49, 0.0  ;;  %v285_v50 = vmul.f32 0.01, %v283_v49 }
 0x225   :  { %v286_v52 = vsel %vm284_vm2, %v283_v49, %v285_v50 }
 0x226   :  { %v288_v53 = vadd.f32 %v287_v51, %v286_v52 }
 0x228   :  { %v290_v54 = vsel %vm289_vm3, %v288_v53, -inf }
 0x229   :  { %291 = vmax.xlane.f32.xlu0 %v290_v54 }
 0x2b2   :  { %v292_v55 = vpop.xlane.xlu0 %291 }
 0x2b3   :  { %v293_v56 = vsub.f32 %v288_v53, %v292_v55 }
 0x2b5   :  { %v294_v57 = vmul.f32 1.442695, %v293_v56 }
 0x2b7   :  { %510 = vpow2.f32 %v294_v57 }
 0x2c4   :  { %v511_v58 = vpop.eup %510 }
 0x2c5   :  { %v296_v59 = vsel %vm289_vm3, %v511_v58, 0.0 }
 0x2c6   :  { %297 = vadd.xlane.f32.xlu1 %v296_v59 }
 0x34f   :  { %v298_v60 = vpop.xlane.xlu1 %297 }
 0x350   :  { %512 = vrcp.f32 %v298_v60 }
 0x35d   :  { %v513_v61 = vpop.eup %512 }
 0x35e   :  { %v300_v62 = vmul.f32 %v513_v61, %v511_v58 }
 0x360   :  { %504 = vmatmul.mubr.msk.f32.vlgmr.msra.gmra.mxu1 %vm301_vm4, %v300_v62 }
 0x420   :  { %v375_v63 = vpop.f32.mrf.mxu1 }
 0x421   :  { %v379_v0 = vmax.f32 %v375_v63, 0.0 }
 0x422   :  { %v505_v1 = vpop.f32.mrf.mxu1 }
 0x423   :  { %380 = vst [vmem:[%s711_s6] sm:$0x3f] %v379_v0 }

// kernel: graph_unet_forward.12
= control target key start
LH: loop header
LB: loop body
LE: loop exit
PB: predicated region body
PF: predicated region fallthrough
CT: control target
= control target key end

     0   :  { %v572_v34 = vmov 0.0   ;;  %vm573_vm0 = vmmov 0   ;;  %v574_v41 = vmov 0   ;;  %v298_v46 = vlaneseq  ;;  %s747_s2 = inlined_call_operand.vmem [shape: f32[128,128], index: 2, kind: input, shape index: {}]   ;;  %s748_s1 = inlined_call_operand.vmem [shape: f32[16,128], index: 1, kind: input, shape index: {}]   ;;  %s749_s4 = inlined_call_operand.vmem [shape: f32[128,1], index: 4, kind: input, shape index: {}]   ;;  %s750_s3 = inlined_call_operand.vmem [shape: f32[1,128], index: 3, kind: input, shape index: {}]   ;;  %s751_s5 = inlined_call_operand.vmem [shape: f32[1,128], index: 5, kind: input, shape index: {}]   ;;  %s752_s0 = inlined_call_operand.vmem [shape: f32[16,16], index: 0, kind: input, shape index: {}]   ;;  %s753_s6 = inlined_call_operand.vmem [shape: f32[16,128], index: 6, kind: input, shape index: {}]   ;;  %s754_s7 = inlined_call_operand.vmem [shape: f32[16,128], index: 7, kind: output, shape index: {}]  }
   0x1   :  { %v43_v0 = vld [vmem:[%s747_s2 + $0x78] sm:$0xff]  ;;  %v42_v1 = vld [vmem:[%s747_s2 + $0x70] sm:$0xff]  ;;  %v41_v2 = vld [vmem:[%s747_s2 + $0x68] sm:$0xff]  ;;  %563 = vset.pattern.permute.xlu0 %v574_v41  ;;  %vm314_vm2 = vcmask 130048  }
   0x2   :  { %476 = vmatprep.subr.mxu0 %v43_v0  ;;  %v40_v3 = vld [vmem:[%s747_s2 + $0x60] sm:$0xff]  ;;  %v39_v5 = vld [vmem:[%s747_s2 + $0x58] sm:$0xff]  ;;  %v140_v7 = vld [vmem:[%s749_s4 + $0x70] sm:$0xff]  ;;  %v299_v47 = vshrl.u32 %v298_v46, 7 }
   0x3   :  { %477 = vmatpush3.msra.mxu0 %v43_v0  ;;  %v26_v4 = vld [vmem:[%s748_s1] sm:$0xff]  ;;  %v141_v6 = vld [vmem:[%s749_s4 + $0x78] sm:$0xff]  ;;  %v38_v8 = vld [vmem:[%s747_s2 + $0x50] sm:$0xff] }
   0x4   :  { %478 = vmatprep.subr.mxu0 %v42_v1  ;;  %508 = vmatprep.mubr.f32.mxu0 %v26_v4  ;;  %v139_v9 = vld [vmem:[%s749_s4 + $0x68] sm:$0xff]  ;;  %v138_v11 = vld [vmem:[%s749_s4 + $0x60] sm:$0xff]  ;;  %v137_v13 = vld [vmem:[%s749_s4 + $0x58] sm:$0xff]  ;;  %v300_v48 = vsub.s32 0, %v299_v47 }
   0x5   :  { %479 = vmatpush3.msra.mxu0 %v42_v1  ;;  %511 = vmatprep.subr.mxu1 %v141_v6  ;;  %v37_v10 = vld [vmem:[%s747_s2 + $0x48] sm:$0xff]  ;;  %v36_v12 = vld [vmem:[%s747_s2 + $0x40] sm:$0xff]  ;;  %v35_v14 = vld [vmem:[%s747_s2 + $0x38] sm:$0xff] }
   0x6   :  { %480 = vmatprep.subr.mxu0 %v41_v2  ;;  %512 = vmatpush3.msra.mxu1 %v141_v6  ;;  %v136_v15 = vld [vmem:[%s749_s4 + $0x50] sm:$0xff]  ;;  %v135_v17 = vld [vmem:[%s749_s4 + $0x48] sm:$0xff]  ;;  %v134_v19 = vld [vmem:[%s749_s4 + $0x40] sm:$0xff] }
   0x7   :  { %481 = vmatpush3.msra.mxu0 %v41_v2  ;;  %513 = vmatprep.subr.mxu1 %v140_v7  ;;  %v34_v16 = vld [vmem:[%s747_s2 + $0x30] sm:$0xff]  ;;  %v33_v18 = vld [vmem:[%s747_s2 + $0x28] sm:$0xff]  ;;  %v32_v20 = vld [vmem:[%s747_s2 + $0x20] sm:$0xff] }
   0x8   :  { %482 = vmatprep.subr.mxu0 %v40_v3  ;;  %514 = vmatpush3.msra.mxu1 %v140_v7  ;;  %v133_v21 = vld [vmem:[%s749_s4 + $0x38] sm:$0xff]  ;;  %v132_v23 = vld [vmem:[%s749_s4 + $0x30] sm:$0xff]  ;;  %v131_v25 = vld [vmem:[%s749_s4 + $0x28] sm:$0xff] }
   0x9   :  { %483 = vmatpush3.msra.mxu0 %v40_v3  ;;  %515 = vmatprep.subr.mxu1 %v139_v9  ;;  %v31_v22 = vld [vmem:[%s747_s2 + $0x18] sm:$0xff]  ;;  %v30_v24 = vld [vmem:[%s747_s2 + $0x10] sm:$0xff]  ;;  %v29_v26 = vld [vmem:[%s747_s2 + $0x8] sm:$0xff] }
   0xa   :  { %484 = vmatprep.subr.mxu0 %v39_v5  ;;  %516 = vmatpush3.msra.mxu1 %v139_v9  ;;  %v130_v27 = vld [vmem:[%s749_s4 + $0x20] sm:$0xff]  ;;  %v129_v29 = vld [vmem:[%s749_s4 + $0x18] sm:$0xff]  ;;  %v27_v30 = vld [vmem:[%s748_s1 + $0x8] sm:$0xff] }
   0xb   :  { %485 = vmatpush3.msra.mxu0 %v39_v5  ;;  %517 = vmatprep.subr.mxu1 %v138_v11  ;;  %v28_v28 = vld [vmem:[%s747_s2] sm:$0xff]  ;;  %v128_v31 = vld [vmem:[%s749_s4 + $0x10] sm:$0xff]  ;;  %v127_v32 = vld [vmem:[%s749_s4 + $0x8] sm:$0xff] }
   0xc   :  { %486 = vmatprep.subr.mxu0 %v38_v8  ;;  %518 = vmatpush3.msra.mxu1 %v138_v11  ;;  %v126_v33 = vld [vmem:[%s749_s4] sm:$0xff]  ;;  %v311_v59 = vld [vmem:[%s752_s0 + $0x8] sm:$0xff] }
   0xd   :  { %487 = vmatpush3.msra.mxu0 %v38_v8  ;;  %519 = vmatprep.subr.mxu1 %v137_v13  ;;  %v430_v35 = vld [vmem:[%s750_s3] ss:$0 sm:$0xff] }
   0xe   :  { %488 = vmatprep.subr.mxu0 %v37_v10  ;;  %520 = vmatpush3.msra.mxu1 %v137_v13  ;;  %v217_v40 = vld [vmem:[%s751_s5] sm:$0x1] }
   0xf   :  { %489 = vmatpush3.msra.mxu0 %v37_v10  ;;  %521 = vmatprep.subr.mxu1 %v136_v15  ;;  %v310_v53 = vld [vmem:[%s752_s0] sm:$0xff] }
  0x10   :  { %490 = vmatprep.subr.mxu0 %v36_v12  ;;  %522 = vmatpush3.msra.mxu1 %v136_v15 }
  0x11   :  { %491 = vmatpush3.msra.mxu0 %v36_v12  ;;  %523 = vmatprep.subr.mxu1 %v135_v17 }
  0x12   :  { %492 = vmatprep.subr.mxu0 %v35_v14  ;;  %524 = vmatpush3.msra.mxu1 %v135_v17  ;;  %v421_v17 = vld [vmem:[%s753_s6 + $0x8] sm:$0xff] }
  0x13   :  { %493 = vmatpush3.msra.mxu0 %v35_v14  ;;  %525 = vmatprep.subr.mxu1 %v134_v19 }
  0x14   :  { %494 = vmatprep.subr.mxu0 %v34_v16  ;;  %526 = vmatpush3.msra.mxu1 %v134_v19 }
  0x15   :  { %495 = vmatpush3.msra.mxu0 %v34_v16  ;;  %527 = vmatprep.subr.mxu1 %v133_v21 }
  0x16   :  { %496 = vmatprep.subr.mxu0 %v33_v18  ;;  %528 = vmatpush3.msra.mxu1 %v133_v21 }
  0x17   :  { %497 = vmatpush3.msra.mxu0 %v33_v18  ;;  %529 = vmatprep.subr.mxu1 %v132_v23 }
  0x18   :  { %498 = vmatprep.subr.mxu0 %v32_v20  ;;  %530 = vmatpush3.msra.mxu1 %v132_v23 }
  0x19   :  { %499 = vmatpush3.msra.mxu0 %v32_v20  ;;  %531 = vmatprep.subr.mxu1 %v131_v25  ;;  %v420_v20 = vld [vmem:[%s753_s6] sm:$0xff] }
  0x1a   :  { %500 = vmatprep.subr.mxu0 %v31_v22  ;;  %532 = vmatpush3.msra.mxu1 %v131_v25 }
  0x1b   :  { %501 = vmatpush3.msra.mxu0 %v31_v22  ;;  %533 = vmatprep.subr.mxu1 %v130_v27 }
  0x1c   :  { %502 = vmatprep.subr.mxu0 %v30_v24  ;;  %534 = vmatpush3.msra.mxu1 %v130_v27 }
  0x1d   :  { %503 = vmatpush3.msra.mxu0 %v30_v24  ;;  %535 = vmatprep.subr.mxu1 %v129_v29 }
  0x1e   :  { %504 = vmatprep.subr.mxu0 %v29_v26  ;;  %536 = vmatpush3.msra.mxu1 %v129_v29 }
  0x1f   :  { %505 = vmatpush3.msra.mxu0 %v29_v26  ;;  %537 = vmatprep.subr.mxu1 %v128_v31 }
  0x20   :  { %506 = vmatprep.subr.mxu0 %v28_v28  ;;  %538 = vmatpush3.msra.mxu1 %v128_v31 }
  0x21   :  { %507 = vmatpush3.msra.mxu0 %v28_v28  ;;  %539 = vmatprep.subr.mxu1 %v127_v32 }
  0x22   :  { %509 = vmatmul.mubr.f32.vlgmr.msra.gmra.mxu0 %v27_v30  ;;  %540 = vmatpush3.msra.mxu1 %v127_v32 }
  0x23   :  { %541 = vmatprep.subr.mxu1 %v126_v33  ;;  %546 = vmatprep.subr.mxu0 %v572_v34 }
  0x24   :  { %542 = vmatpush3.msra.mxu1 %v126_v33  ;;  %550 = vmatprep.mubr.msk.f32.mxu0 %vm573_vm0, %v572_v34 }
  0xe2   :  { %v510_v36 = vpop.f32.mrf.mxu0 }
  0xe3   :  { %v123_v37 = vadd.f32 %v510_v36, %v430_v35 }
  0xe4   :  { %v117_v38 = vpop.f32.mrf.mxu0 }
  0xe5   :  { %v118_v39 = vadd.f32 %v430_v35, %v117_v38  ;;  %547 = vmatpush3.xpose.msra.mxu0 %v123_v37  ;;  %553 = vmatprep.subr.mxu1 %v123_v37 }
  0xe6   :  { %548 = vmatprep.subr.mxu0 %v572_v34 }
  0xe7   :  { %543 = vmatprep.mubr.f32.mxu1 %v118_v39 }
  0xe8   :  { %544 = vmatmul.mubr.f32.vlgmr.msra.gmra.mxu1 %v123_v37 }
  0xe9   :  { %554 = vmatpush3.msra.mxu1 %v123_v37  ;;  %549 = vmatpush3.xpose.msra.mxu0 %v118_v39 }
  0xea   :  { %555 = vmatprep.subr.mxu1 %v118_v39 }
  0xeb   :  { %556 = vmatpush3.msra.mxu1 %v118_v39 }
  0xec   :  { %551 = vmatmul.mubr.f32.vlgmr.msra.gmra.mxu0 %v217_v40 }
 0x1a8   :  { %v545_v42 = vpop.f32.mrf.mxu1 }
 0x1aa   :  { %v208_v43 = vpop.f32.mrf.mxu1 }
 0x1ab   :  { %290 = vperm.xlu0 %563, %v208_v43  }
 0x1ac   :  { %v284_v44 = vpop.f32.mrf.mxu0 }
 0x1ad   :  { %v301_v49 = vrot.slane %v284_v44, %v300_v48 }
 0x1ae   :  { %v552_v45 = vpop.f32.mrf.mxu0 }
 0x1af   :  { %295 = vperm.xlu0 %563, %v545_v42  }
 0x226   :  { %v291_v50 = vpop.permute.xlu0 %290 }
 0x227   :  { %v302_v51 = vadd.f32 %v301_v49, %v291_v50 }
 0x229   :  { %v306_v52 = vmul.f32 0.01, %v302_v51  ;;  %vm304_vm1 = vcmp.ge.f32.partialorder %v302_v51, 0.0 }
 0x22a   :  { %v296_v54 = vpop.permute.xlu0 %295 }
 0x22b   :  { %v303_v55 = vadd.f32 %v301_v49, %v296_v54  ;;  %v308_v56 = vsel %vm304_vm1, %v302_v51, %v306_v52 }
 0x22c   :  { %v312_v57 = vadd.f32 %v310_v53, %v308_v56 }
 0x22d   :  { %vm305_vm3 = vcmp.ge.f32.partialorder %v303_v55, 0.0  ;;  %v307_v58 = vmul.f32 0.01, %v303_v55 }
 0x22e   :  { %v315_v60 = vsel %vm314_vm2, %v312_v57, -inf }
 0x22f   :  { %316 = vmax.xlane.f32.xlu1 %v315_v60  ;;  %v309_v61 = vsel %vm305_vm3, %v303_v55, %v307_v58 }
 0x230   :  { %v313_v62 = vadd.f32 %v311_v59, %v309_v61 }
 0x232   :  { %v318_v63 = vsel %vm314_vm2, %v313_v62, -inf }
 0x233   :  { %319 = vmax.xlane.f32.xlu1 %v318_v63 }
 0x2b8   :  { %v317_v0 = vpop.xlane.xlu1 %316 }
 0x2b9   :  { %v321_v1 = vsub.f32 %v312_v57, %v317_v0 }
 0x2bb   :  { %v323_v2 = vmul.f32 1.442695, %v321_v1 }
 0x2bc   :  { %v320_v3 = vpop.xlane.xlu1 %319 }
 0x2bd   :  { %564 = vpow2.f32 %v323_v2  ;;  %v322_v4 = vsub.f32 %v313_v62, %v320_v3 }
 0x2bf   :  { %v325_v5 = vmul.f32 1.442695, %v322_v4 }
 0x2c1   :  { %566 = vpow2.f32 %v325_v5 }
 0x2ca   :  { %v565_v6 = vpop.eup %564 }
 0x2cb   :  { %v327_v7 = vsel %vm314_vm2, %v565_v6, 0.0 }
 0x2cc   :  { %328 = vadd.xlane.f32.xlu0 %v327_v7 }
 0x2ce   :  { %v567_v8 = vpop.eup %566 }
 0x2cf   :  { %v330_v9 = vsel %vm314_vm2, %v567_v8, 0.0 }
 0x2d0   :  { %331 = vadd.xlane.f32.xlu1 %v330_v9 }
 0x355   :  { %v329_v10 = vpop.xlane.xlu0 %328 }
 0x356   :  { %568 = vrcp.f32 %v329_v10 }
 0x359   :  { %v332_v11 = vpop.xlane.xlu1 %331 }
 0x35a   :  { %570 = vrcp.f32 %v332_v11 }
 0x363   :  { %v569_v12 = vpop.eup %568 }
 0x364   :  { %v335_v13 = vmul.f32 %v569_v12, %v565_v6 }
 0x366   :  { %557 = vmatprep.mubr.msk.f32.mxu1 %vm314_vm2, %v335_v13 }
 0x367   :  { %v571_v14 = vpop.eup %570 }
 0x368   :  { %v336_v15 = vmul.f32 %v571_v14, %v567_v8 }
 0x36a   :  { %558 = vmatmul.mubr.msk.f32.vlgmr.msra.gmra.mxu1 %vm314_vm2, %v336_v15 }
 0x42a   :  { %v559_v16 = vpop.f32.mrf.mxu1 }
 0x42b   :  { %v419_v18 = vmax.f32 %v559_v16, 0.0 }
 0x42c   :  { %v409_v19 = vpop.f32.mrf.mxu1 }
 0x42d   :  { %v423_v21 = vadd.f32 %v421_v17, %v419_v18  ;;  %v418_v22 = vmax.f32 %v409_v19, 0.0 }
 0x42f   :  { %425 = vst [vmem:[%s754_s7 + $0x8] sm:$0xff] %v423_v21  ;;  %v422_v23 = vadd.f32 %v420_v20, %v418_v22 }
 0x431   :  { %424 = vst [vmem:[%s754_s7] sm:$0xff] %v422_v23 }

// kernel: graph_unet_forward.11
= control target key start
LH: loop header
LB: loop body
LE: loop exit
PB: predicated region body
PF: predicated region fallthrough
CT: control target
= control target key end

     0   :  { %v578_v34 = vmov 0.0   ;;  %vm579_vm0 = vmmov 0   ;;  %vm344_vm1 = vcmask 1043456   ;;  %v580_v41 = vmov 0   ;;  %s753_s2 = inlined_call_operand.vmem [shape: f32[128,128], index: 2, kind: input, shape index: {}]   ;;  %s754_s1 = inlined_call_operand.vmem [shape: f32[12,128], index: 1, kind: input, shape index: {}]   ;;  %s755_s4 = inlined_call_operand.vmem [shape: f32[128,1], index: 4, kind: input, shape index: {}]   ;;  %s756_s3 = inlined_call_operand.vmem [shape: f32[1,128], index: 3, kind: input, shape index: {}]   ;;  %s757_s5 = inlined_call_operand.vmem [shape: f32[1,128], index: 5, kind: input, shape index: {}]   ;;  %s758_s0 = inlined_call_operand.vmem [shape: f32[12,12], index: 0, kind: input, shape index: {}]   ;;  %s759_s6 = inlined_call_operand.vmem [shape: f32[12,128], index: 6, kind: input, shape index: {}]   ;;  %s760_s7 = inlined_call_operand.vmem [shape: f32[12,128], index: 7, kind: output, shape index: {}]  }
   0x1   :  { %v43_v0 = vld [vmem:[%s753_s2 + $0x78] sm:$0xff]  ;;  %v42_v1 = vld [vmem:[%s753_s2 + $0x70] sm:$0xff]  ;;  %v41_v2 = vld [vmem:[%s753_s2 + $0x68] sm:$0xff]  ;;  %569 = vset.pattern.permute.xlu0 %v580_v41  ;;  %v298_v46 = vlaneseq  ;;  %vm314_vm3 = vcmask 97280   ;;  %vm318_vm5 = vcmask 93184  }
   0x2   :  { %482 = vmatprep.subr.mxu0 %v43_v0  ;;  %v40_v3 = vld [vmem:[%s753_s2 + $0x60] sm:$0xff]  ;;  %v39_v5 = vld [vmem:[%s753_s2 + $0x58] sm:$0xff]  ;;  %v140_v7 = vld [vmem:[%s755_s4 + $0x70] sm:$0xff] }
   0x3   :  { %483 = vmatpush3.msra.mxu0 %v43_v0  ;;  %v26_v4 = vld [vmem:[%s754_s1] sm:$0xff]  ;;  %v141_v6 = vld [vmem:[%s755_s4 + $0x78] sm:$0xff]  ;;  %v38_v8 = vld [vmem:[%s753_s2 + $0x50] sm:$0xff]  ;;  %v299_v47 = vshrl.u32 %v298_v46, 7 }
   0x4   :  { %484 = vmatprep.subr.mxu0 %v42_v1  ;;  %514 = vmatprep.mubr.f32.mxu0 %v26_v4  ;;  %v139_v9 = vld [vmem:[%s755_s4 + $0x68] sm:$0xff]  ;;  %v138_v11 = vld [vmem:[%s755_s4 + $0x60] sm:$0xff]  ;;  %v137_v13 = vld [vmem:[%s755_s4 + $0x58] sm:$0xff] }
   0x5   :  { %485 = vmatpush3.msra.mxu0 %v42_v1  ;;  %517 = vmatprep.subr.mxu1 %v141_v6  ;;  %v37_v10 = vld [vmem:[%s753_s2 + $0x48] sm:$0xff]  ;;  %v36_v12 = vld [vmem:[%s753_s2 + $0x40] sm:$0xff]  ;;  %v35_v14 = vld [vmem:[%s753_s2 + $0x38] sm:$0xff]  ;;  %v300_v48 = vsub.s32 0, %v299_v47 }
   0x6   :  { %486 = vmatprep.subr.mxu0 %v41_v2  ;;  %518 = vmatpush3.msra.mxu1 %v141_v6  ;;  %v136_v15 = vld [vmem:[%s755_s4 + $0x50] sm:$0xff]  ;;  %v135_v17 = vld [vmem:[%s755_s4 + $0x48] sm:$0xff]  ;;  %v134_v19 = vld [vmem:[%s755_s4 + $0x40] sm:$0xff] }
   0x7   :  { %487 = vmatpush3.msra.mxu0 %v41_v2  ;;  %519 = vmatprep.subr.mxu1 %v140_v7  ;;  %v34_v16 = vld [vmem:[%s753_s2 + $0x30] sm:$0xff]  ;;  %v33_v18 = vld [vmem:[%s753_s2 + $0x28] sm:$0xff]  ;;  %v32_v20 = vld [vmem:[%s753_s2 + $0x20] sm:$0xff] }
   0x8   :  { %488 = vmatprep.subr.mxu0 %v40_v3  ;;  %520 = vmatpush3.msra.mxu1 %v140_v7  ;;  %v133_v21 = vld [vmem:[%s755_s4 + $0x38] sm:$0xff]  ;;  %v132_v23 = vld [vmem:[%s755_s4 + $0x30] sm:$0xff]  ;;  %v131_v25 = vld [vmem:[%s755_s4 + $0x28] sm:$0xff] }
   0x9   :  { %489 = vmatpush3.msra.mxu0 %v40_v3  ;;  %521 = vmatprep.subr.mxu1 %v139_v9  ;;  %v31_v22 = vld [vmem:[%s753_s2 + $0x18] sm:$0xff]  ;;  %v30_v24 = vld [vmem:[%s753_s2 + $0x10] sm:$0xff]  ;;  %v29_v26 = vld [vmem:[%s753_s2 + $0x8] sm:$0xff] }
   0xa   :  { %490 = vmatprep.subr.mxu0 %v39_v5  ;;  %522 = vmatpush3.msra.mxu1 %v139_v9  ;;  %v130_v27 = vld [vmem:[%s755_s4 + $0x20] sm:$0xff]  ;;  %v129_v29 = vld [vmem:[%s755_s4 + $0x18] sm:$0xff]  ;;  %v27_v30 = vld [vmem:[%s754_s1 + $0x8] sm:$0xf] }
   0xb   :  { %491 = vmatpush3.msra.mxu0 %v39_v5  ;;  %523 = vmatprep.subr.mxu1 %v138_v11  ;;  %v28_v28 = vld [vmem:[%s753_s2] sm:$0xff]  ;;  %v128_v31 = vld [vmem:[%s755_s4 + $0x10] sm:$0xff]  ;;  %v127_v32 = vld [vmem:[%s755_s4 + $0x8] sm:$0xff] }
   0xc   :  { %492 = vmatprep.subr.mxu0 %v38_v8  ;;  %524 = vmatpush3.msra.mxu1 %v138_v11  ;;  %v126_v33 = vld [vmem:[%s755_s4] sm:$0xff]  ;;  %v311_v59 = vld [vmem:[%s758_s0 + $0x8] sm:$0xf] }
   0xd   :  { %493 = vmatpush3.msra.mxu0 %v38_v8  ;;  %525 = vmatprep.subr.mxu1 %v137_v13  ;;  %v435_v35 = vld [vmem:[%s756_s3] ss:$0 sm:$0xff] }
   0xe   :  { %494 = vmatprep.subr.mxu0 %v37_v10  ;;  %526 = vmatpush3.msra.mxu1 %v137_v13  ;;  %v217_v40 = vld [vmem:[%s757_s5] sm:$0x1] }
   0xf   :  { %495 = vmatpush3.msra.mxu0 %v37_v10  ;;  %527 = vmatprep.subr.mxu1 %v136_v15  ;;  %v310_v53 = vld [vmem:[%s758_s0] sm:$0xff] }
  0x10   :  { %496 = vmatprep.subr.mxu0 %v36_v12  ;;  %528 = vmatpush3.msra.mxu1 %v136_v15 }
  0x11   :  { %497 = vmatpush3.msra.mxu0 %v36_v12  ;;  %529 = vmatprep.subr.mxu1 %v135_v17 }
  0x12   :  { %498 = vmatprep.subr.mxu0 %v35_v14  ;;  %530 = vmatpush3.msra.mxu1 %v135_v17  ;;  %v426_v17 = vld [vmem:[%s759_s6 + $0x8] sm:$0xf] }
  0x13   :  { %499 = vmatpush3.msra.mxu0 %v35_v14  ;;  %531 = vmatprep.subr.mxu1 %v134_v19 }
  0x14   :  { %500 = vmatprep.subr.mxu0 %v34_v16  ;;  %532 = vmatpush3.msra.mxu1 %v134_v19 }
  0x15   :  { %501 = vmatpush3.msra.mxu0 %v34_v16  ;;  %533 = vmatprep.subr.mxu1 %v133_v21 }
  0x16   :  { %502 = vmatprep.subr.mxu0 %v33_v18  ;;  %534 = vmatpush3.msra.mxu1 %v133_v21 }
  0x17   :  { %503 = vmatpush3.msra.mxu0 %v33_v18  ;;  %535 = vmatprep.subr.mxu1 %v132_v23 }
  0x18   :  { %504 = vmatprep.subr.mxu0 %v32_v20  ;;  %536 = vmatpush3.msra.mxu1 %v132_v23 }
  0x19   :  { %505 = vmatpush3.msra.mxu0 %v32_v20  ;;  %537 = vmatprep.subr.mxu1 %v131_v25  ;;  %v425_v20 = vld [vmem:[%s759_s6] sm:$0xff] }
  0x1a   :  { %506 = vmatprep.subr.mxu0 %v31_v22  ;;  %538 = vmatpush3.msra.mxu1 %v131_v25 }
  0x1b   :  { %507 = vmatpush3.msra.mxu0 %v31_v22  ;;  %539 = vmatprep.subr.mxu1 %v130_v27 }
  0x1c   :  { %508 = vmatprep.subr.mxu0 %v30_v24  ;;  %540 = vmatpush3.msra.mxu1 %v130_v27 }
  0x1d   :  { %509 = vmatpush3.msra.mxu0 %v30_v24  ;;  %541 = vmatprep.subr.mxu1 %v129_v29 }
  0x1e   :  { %510 = vmatprep.subr.mxu0 %v29_v26  ;;  %542 = vmatpush3.msra.mxu1 %v129_v29 }
  0x1f   :  { %511 = vmatpush3.msra.mxu0 %v29_v26  ;;  %543 = vmatprep.subr.mxu1 %v128_v31 }
  0x20   :  { %512 = vmatprep.subr.mxu0 %v28_v28  ;;  %544 = vmatpush3.msra.mxu1 %v128_v31 }
  0x21   :  { %513 = vmatpush3.msra.mxu0 %v28_v28  ;;  %545 = vmatprep.subr.mxu1 %v127_v32 }
  0x22   :  { %515 = vmatmul.mubr.f32.vlgmr.msra.gmra.mxu0 %v27_v30  ;;  %546 = vmatpush3.msra.mxu1 %v127_v32 }
  0x23   :  { %547 = vmatprep.subr.mxu1 %v126_v33  ;;  %552 = vmatprep.subr.mxu0 %v578_v34 }
  0x24   :  { %548 = vmatpush3.msra.mxu1 %v126_v33  ;;  %556 = vmatprep.mubr.msk.f32.mxu0 %vm579_vm0, %v578_v34 }
  0xe2   :  { %v516_v36 = vpop.f32.mrf.mxu0 }
  0xe3   :  { %v123_v37 = vadd.f32 %v516_v36, %v435_v35 }
  0xe4   :  { %v117_v38 = vpop.f32.mrf.mxu0 }
  0xe5   :  { %v118_v39 = vadd.f32 %v435_v35, %v117_v38  ;;  %553 = vmatpush3.xpose.msra.mxu0 %v123_v37  ;;  %559 = vmatprep.subr.msk.mxu1 %vm344_vm1, %v123_v37 }
  0xe6   :  { %554 = vmatprep.subr.mxu0 %v578_v34 }
  0xe7   :  { %549 = vmatprep.mubr.f32.mxu1 %v118_v39 }
  0xe8   :  { %550 = vmatmul.mubr.f32.vlgmr.msra.gmra.mxu1 %v123_v37 }
  0xe9   :  { %560 = vmatpush3.msk.msra.mxu1 %vm344_vm1, %v123_v37  ;;  %555 = vmatpush3.xpose.msra.mxu0 %v118_v39 }
  0xea   :  { %561 = vmatprep.subr.mxu1 %v118_v39 }
  0xeb   :  { %562 = vmatpush3.msra.mxu1 %v118_v39 }
  0xec   :  { %557 = vmatmul.mubr.f32.vlgmr.msra.gmra.mxu0 %v217_v40 }
 0x1a8   :  { %v551_v42 = vpop.f32.mrf.mxu1 }
 0x1aa   :  { %v208_v43 = vpop.f32.mrf.mxu1 }
 0x1ab   :  { %290 = vperm.xlu0 %569, %v208_v43  }
 0x1ac   :  { %v284_v44 = vpop.f32.mrf.mxu0 }
 0x1ad   :  { %v301_v49 = vrot.slane %v284_v44, %v300_v48 }
 0x1ae   :  { %v558_v45 = vpop.f32.mrf.mxu0 }
 0x1af   :  { %295 = vperm.xlu0 %569, %v551_v42  }
 0x226   :  { %v291_v50 = vpop.permute.xlu0 %290 }
 0x227   :  { %v302_v51 = vadd.f32 %v301_v49, %v291_v50 }
 0x229   :  { %v306_v52 = vmul.f32 0.01, %v302_v51  ;;  %vm304_vm2 = vcmp.ge.f32.partialorder %v302_v51, 0.0 }
 0x22a   :  { %v296_v54 = vpop.permute.xlu0 %295 }
 0x22b   :  { %v303_v55 = vadd.f32 %v301_v49, %v296_v54  ;;  %v308_v56 = vsel %vm304_vm2, %v302_v51, %v306_v52 }
 0x22c   :  { %v312_v57 = vadd.f32 %v310_v53, %v308_v56 }
 0x22d   :  { %vm305_vm4 = vcmp.ge.f32.partialorder %v303_v55, 0.0  ;;  %v307_v58 = vmul.f32 0.01, %v303_v55 }
 0x22e   :  { %v315_v60 = vsel %vm314_vm3, %v312_v57, -inf }
 0x22f   :  { %316 = vmax.xlane.f32.xlu1 %v315_v60  ;;  %v309_v61 = vsel %vm305_vm4, %v303_v55, %v307_v58 }
 0x230   :  { %v313_v62 = vadd.f32 %v311_v59, %v309_v61 }
 0x232   :  { %v319_v63 = vsel %vm318_vm5, %v313_v62, -inf }
 0x233   :  { %320 = vmax.xlane.f32.xlu1 %v319_v63 }
 0x2b8   :  { %v317_v0 = vpop.xlane.xlu1 %316 }
 0x2b9   :  { %v322_v1 = vsub.f32 %v312_v57, %v317_v0 }
 0x2bb   :  { %v324_v2 = vmul.f32 1.442695, %v322_v1 }
 0x2bc   :  { %v321_v3 = vpop.xlane.xlu1 %320 }
 0x2bd   :  { %570 = vpow2.f32 %v324_v2  ;;  %v323_v4 = vsub.f32 %v313_v62, %v321_v3 }
 0x2bf   :  { %v326_v5 = vmul.f32 1.442695, %v323_v4 }
 0x2c1   :  { %572 = vpow2.f32 %v326_v5 }
 0x2ca   :  { %v571_v6 = vpop.eup %570 }
 0x2cb   :  { %v328_v7 = vsel %vm314_vm3, %v571_v6, 0.0 }
 0x2cc   :  { %329 = vadd.xlane.f32.xlu0 %v328_v7 }
 0x2ce   :  { %v573_v8 = vpop.eup %572 }
 0x2cf   :  { %v331_v9 = vsel %vm318_vm5, %v573_v8, 0.0 }
 0x2d0   :  { %332 = vadd.xlane.f32.xlu1 %v331_v9 }
 0x355   :  { %v330_v10 = vpop.xlane.xlu0 %329 }
 0x356   :  { %574 = vrcp.f32 %v330_v10 }
 0x359   :  { %v333_v11 = vpop.xlane.xlu1 %332 }
 0x35a   :  { %576 = vrcp.f32 %v333_v11 }
 0x363   :  { %v575_v12 = vpop.eup %574 }
 0x364   :  { %v336_v13 = vmul.f32 %v575_v12, %v571_v6 }
 0x366   :  { %563 = vmatprep.mubr.msk.f32.mxu1 %vm314_vm3, %v336_v13 }
 0x367   :  { %v577_v14 = vpop.eup %576 }
 0x368   :  { %v337_v15 = vmul.f32 %v577_v14, %v573_v8 }
 0x36a   :  { %564 = vmatmul.mubr.msk.f32.vlgmr.msra.gmra.mxu1 %vm314_vm3, %v337_v15 }
 0x42a   :  { %v565_v16 = vpop.f32.mrf.mxu1 }
 0x42b   :  { %v424_v18 = vmax.f32 %v565_v16, 0.0 }
 0x42c   :  { %v414_v19 = vpop.f32.mrf.mxu1 }
 0x42d   :  { %v428_v21 = vadd.f32 %v426_v17, %v424_v18  ;;  %v423_v22 = vmax.f32 %v414_v19, 0.0 }
 0x42f   :  { %430 = vst [vmem:[%s760_s7 + $0x8] sm:$0xf] %v428_v21  ;;  %v427_v23 = vadd.f32 %v425_v20, %v423_v22 }
 0x431   :  { %429 = vst [vmem:[%s760_s7] sm:$0xff] %v427_v23 }

// kernel: graph_unet_forward.13
= control target key start
LH: loop header
LB: loop body
LE: loop exit
PB: predicated region body
PF: predicated region fallthrough
CT: control target
= control target key end

     0   :  { %s985_s0 = inlined_call_operand.vmem [shape: f32[16,16], index: 0, kind: input, shape index: {}]   ;;  %s986_s1 = inlined_call_operand.vmem [shape: f32[16,128], index: 1, kind: input, shape index: {}]   ;;  %s987_s2 = inlined_call_operand.vmem [shape: f32[128,128], index: 2, kind: input, shape index: {}]   ;;  %s988_s3 = inlined_call_operand.vmem [shape: f32[16,128], index: 3, kind: input, shape index: {}]   ;;  %s989_s4 = inlined_call_operand.vmem [shape: f32[128,128], index: 4, kind: input, shape index: {}]   ;;  %s990_s5 = inlined_call_operand.vmem [shape: f32[1,128], index: 5, kind: input, shape index: {}]   ;;  %s991_s6 = inlined_call_operand.vmem [shape: f32[128,1], index: 6, kind: input, shape index: {}]   ;;  %s992_s7 = inlined_call_operand.vmem [shape: f32[1,128], index: 7, kind: input, shape index: {}]   ;;  %s993_s8 = inlined_call_operand.hbm [shape: f32[16,128], index: 8, kind: output, shape index: {}]  }
   0x1   :  { %v65_v0 = vld [vmem:[%s989_s4 + $0x78] sm:$0xff]  ;;  %v64_v2 = vld [vmem:[%s989_s4 + $0x70] sm:$0xff]  ;;  %v63_v4 = vld [vmem:[%s989_s4 + $0x68] sm:$0xff] }
   0x2   :  { %v47_v1 = vld [vmem:[%s987_s2 + $0x78] sm:$0xff]  ;;  %601 = vmatprep.subr.mxu0 %v65_v0  ;;  %v46_v3 = vld [vmem:[%s987_s2 + $0x70] sm:$0xff]  ;;  %v45_v5 = vld [vmem:[%s987_s2 + $0x68] sm:$0xff] }
   0x3   :  { %636 = vmatprep.subr.mxu1 %v47_v1  ;;  %602 = vmatpush3.msra.mxu0 %v65_v0  ;;  %v62_v6 = vld [vmem:[%s989_s4 + $0x60] sm:$0xff]  ;;  %v61_v8 = vld [vmem:[%s989_s4 + $0x58] sm:$0xff]  ;;  %v60_v10 = vld [vmem:[%s989_s4 + $0x50] sm:$0xff] }
   0x4   :  { %637 = vmatpush3.msra.mxu1 %v47_v1  ;;  %603 = vmatprep.subr.mxu0 %v64_v2  ;;  %v44_v7 = vld [vmem:[%s987_s2 + $0x60] sm:$0xff]  ;;  %v43_v9 = vld [vmem:[%s987_s2 + $0x58] sm:$0xff]  ;;  %v42_v11 = vld [vmem:[%s987_s2 + $0x50] sm:$0xff] }
   0x5   :  { %638 = vmatprep.subr.mxu1 %v46_v3  ;;  %604 = vmatpush3.msra.mxu0 %v64_v2  ;;  %v59_v12 = vld [vmem:[%s989_s4 + $0x48] sm:$0xff]  ;;  %v58_v14 = vld [vmem:[%s989_s4 + $0x40] sm:$0xff]  ;;  %v57_v16 = vld [vmem:[%s989_s4 + $0x38] sm:$0xff] }
   0x6   :  { %639 = vmatpush3.msra.mxu1 %v46_v3  ;;  %605 = vmatprep.subr.mxu0 %v63_v4  ;;  %v41_v13 = vld [vmem:[%s987_s2 + $0x48] sm:$0xff]  ;;  %v40_v15 = vld [vmem:[%s987_s2 + $0x40] sm:$0xff]  ;;  %v39_v17 = vld [vmem:[%s987_s2 + $0x38] sm:$0xff] }
   0x7   :  { %640 = vmatprep.subr.mxu1 %v45_v5  ;;  %606 = vmatpush3.msra.mxu0 %v63_v4  ;;  %v56_v18 = vld [vmem:[%s989_s4 + $0x30] sm:$0xff] }
   0x8   :  { %641 = vmatpush3.msra.mxu1 %v45_v5  ;;  %607 = vmatprep.subr.mxu0 %v62_v6  ;;  %v38_v19 = vld [vmem:[%s987_s2 + $0x30] sm:$0xff] }
   0x9   :  { %642 = vmatprep.subr.mxu1 %v44_v7  ;;  %608 = vmatpush3.msra.mxu0 %v62_v6 }
   0xa   :  { %643 = vmatpush3.msra.mxu1 %v44_v7  ;;  %609 = vmatprep.subr.mxu0 %v61_v8 }
   0xb   :  { %644 = vmatprep.subr.mxu1 %v43_v9  ;;  %610 = vmatpush3.msra.mxu0 %v61_v8 }
   0xc   :  { %645 = vmatpush3.msra.mxu1 %v43_v9  ;;  %611 = vmatprep.subr.mxu0 %v60_v10 }
   0xd   :  { %646 = vmatprep.subr.mxu1 %v42_v11  ;;  %612 = vmatpush3.msra.mxu0 %v60_v10 }
   0xe   :  { %647 = vmatpush3.msra.mxu1 %v42_v11  ;;  %613 = vmatprep.subr.mxu0 %v59_v12 }
   0xf   :  { %648 = vmatprep.subr.mxu1 %v41_v13  ;;  %614 = vmatpush3.msra.mxu0 %v59_v12 }
  0x10   :  { %649 = vmatpush3.msra.mxu1 %v41_v13  ;;  %615 = vmatprep.subr.mxu0 %v58_v14 }
  0x11   :  { %650 = vmatprep.subr.mxu1 %v40_v15  ;;  %616 = vmatpush3.msra.mxu0 %v58_v14 }
  0x12   :  { %651 = vmatpush3.msra.mxu1 %v40_v15 }
  0x13   :  { %13 = vsyncpa [#allocation3], 0  ;;  %617 = vmatprep.subr.mxu0 %v57_v16  ;;  %652 = vmatprep.subr.mxu1 %v39_v17  ;;  %v55_v20 = vld [vmem:[%s989_s4 + $0x28] sm:$0xff]  ;;  %v54_v22 = vld [vmem:[%s989_s4 + $0x20] sm:$0xff]  ;;  %v757_v51 = vmov 0.0   ;;  %vm758_vm0 = vmmov 0   ;;  %v397_v4 = vlaneseq }
  0x14   :  { %618 = vmatpush3.msra.mxu0 %v57_v16  ;;  %653 = vmatpush3.msra.mxu1 %v39_v17  ;;  %v37_v21 = vld [vmem:[%s987_s2 + $0x28] sm:$0xff]  ;;  %v36_v23 = vld [vmem:[%s987_s2 + $0x20] sm:$0xff]  ;;  %v53_v24 = vld [vmem:[%s989_s4 + $0x18] sm:$0xff]  ;;  %v759_v63 = vmov 0   ;;  %vm413_vm2 = vcmask 130048  }
  0x15   :  { %619 = vmatprep.subr.mxu0 %v56_v18  ;;  %654 = vmatprep.subr.mxu1 %v38_v19  ;;  %v35_v25 = vld [vmem:[%s987_s2 + $0x18] sm:$0xff]  ;;  %v52_v26 = vld [vmem:[%s989_s4 + $0x10] sm:$0xff]  ;;  %v51_v28 = vld [vmem:[%s989_s4 + $0x8] sm:$0xff]  ;;  %v398_v5 = vshrl.u32 %v397_v4, 7 }
  0x16   :  { %620 = vmatpush3.msra.mxu0 %v56_v18  ;;  %655 = vmatpush3.msra.mxu1 %v38_v19  ;;  %v34_v27 = vld [vmem:[%s987_s2 + $0x10] sm:$0xff]  ;;  %v33_v29 = vld [vmem:[%s987_s2 + $0x8] sm:$0xff]  ;;  %v50_v30 = vld [vmem:[%s989_s4] sm:$0xff] }
  0x17   :  { %621 = vmatprep.subr.mxu0 %v55_v20  ;;  %656 = vmatprep.subr.mxu1 %v37_v21  ;;  %v32_v31 = vld [vmem:[%s987_s2] sm:$0xff]  ;;  %v49_v34 = vld [vmem:[%s988_s3 + $0x8] sm:$0xff]  ;;  %v240_v36 = vld [vmem:[%s991_s6 + $0x78] sm:$0xff]  ;;  %v399_v6 = vsub.s32 0, %v398_v5 }
  0x18   :  { %622 = vmatpush3.msra.mxu0 %v55_v20  ;;  %657 = vmatpush3.msra.mxu1 %v37_v21  ;;  %v48_v32 = vld [vmem:[%s988_s3] sm:$0xff]  ;;  %v31_v35 = vld [vmem:[%s986_s1 + $0x8] sm:$0xff]  ;;  %v239_v37 = vld [vmem:[%s991_s6 + $0x70] sm:$0xff] }
  0x19   :  { %623 = vmatprep.subr.mxu0 %v54_v22  ;;  %658 = vmatprep.subr.mxu1 %v36_v23  ;;  %v30_v33 = vld [vmem:[%s986_s1] sm:$0xff]  ;;  %v238_v38 = vld [vmem:[%s991_s6 + $0x68] sm:$0xff]  ;;  %v236_v40 = vld [vmem:[%s991_s6 + $0x58] sm:$0xff] }
  0x1a   :  { %624 = vmatpush3.msra.mxu0 %v54_v22  ;;  %659 = vmatpush3.msra.mxu1 %v36_v23  ;;  %v237_v39 = vld [vmem:[%s991_s6 + $0x60] sm:$0xff]  ;;  %v235_v41 = vld [vmem:[%s991_s6 + $0x50] sm:$0xff]  ;;  %v234_v42 = vld [vmem:[%s991_s6 + $0x48] sm:$0xff] }
  0x1b   :  { %625 = vmatprep.subr.mxu0 %v53_v24  ;;  %660 = vmatprep.subr.mxu1 %v35_v25  ;;  %v233_v43 = vld [vmem:[%s991_s6 + $0x40] sm:$0xff]  ;;  %v232_v44 = vld [vmem:[%s991_s6 + $0x38] sm:$0xff]  ;;  %v231_v45 = vld [vmem:[%s991_s6 + $0x30] sm:$0xff] }
  0x1c   :  { %626 = vmatpush3.msra.mxu0 %v53_v24  ;;  %661 = vmatpush3.msra.mxu1 %v35_v25  ;;  %v230_v46 = vld [vmem:[%s991_s6 + $0x28] sm:$0xff]  ;;  %v229_v47 = vld [vmem:[%s991_s6 + $0x20] sm:$0xff]  ;;  %v228_v48 = vld [vmem:[%s991_s6 + $0x18] sm:$0xff] }
  0x1d   :  { %627 = vmatprep.subr.mxu0 %v52_v26  ;;  %662 = vmatprep.subr.mxu1 %v34_v27  ;;  %v227_v49 = vld [vmem:[%s991_s6 + $0x10] sm:$0xff]  ;;  %v226_v50 = vld [vmem:[%s991_s6 + $0x8] sm:$0xff]  ;;  %v225_v52 = vld [vmem:[%s991_s6] sm:$0xff] }
  0x1e   :  { %628 = vmatpush3.msra.mxu0 %v52_v26  ;;  %663 = vmatpush3.msra.mxu1 %v34_v27  ;;  %v537_v55 = vld [vmem:[%s990_s5] ss:$0 sm:$0xff]  ;;  %v410_v17 = vld [vmem:[%s985_s0 + $0x8] sm:$0xff] }
  0x1f   :  { %629 = vmatprep.subr.mxu0 %v51_v28  ;;  %664 = vmatprep.subr.mxu1 %v33_v29  ;;  %v316_v62 = vld [vmem:[%s992_s7] sm:$0x1] }
  0x20   :  { %630 = vmatpush3.msra.mxu0 %v51_v28  ;;  %665 = vmatpush3.msra.mxu1 %v33_v29  ;;  %v409_v11 = vld [vmem:[%s985_s0] sm:$0xff]  ;;  %s760_s0 = smov [#allocation2]  }
  0x21   :  { %631 = vmatprep.subr.mxu0 %v50_v30  ;;  %666 = vmatprep.subr.mxu1 %v32_v31  ;;  %s526_s18 = sshll.u32 %s760_s0, 4  ;;  %s527_s18 = int_to_ptr.vmem [resolvable:$true] %s526_s18 }
  0x22   :  { %632 = vmatpush3.msra.mxu0 %v50_v30  ;;  %633 = vmatprep.mubr.f32.mxu0 %v48_v32  ;;  %s735_s19 = scalar_lea.vmem %s527_s18, 256  ;;  %p740_p1 = scmp.lt.s32.totalorder %s527_s18, %s527_s18 }
  0x23   :  { %667 = vmatpush3.msra.mxu1 %v32_v31  ;;  %668 = vmatprep.mubr.f32.mxu1 %v30_v33  ;;  %p736_p0 = scmp.ne.s32.totalorder %s527_s18, %s735_s19  ;;  %p741_p2 = scmp.lt.s32.totalorder %s735_s19, %s735_s19 }
  0x24   :  { %634 = vmatmul.mubr.f32.vlgmr.msra.gmra.mxu0 %v49_v34  ;;  %669 = vmatmul.mubr.f32.vlgmr.msra.gmra.mxu1 %v31_v35 }
  0x25   :  { %671 = vmatprep.subr.mxu0 %v240_v36  ;;  %706 = vmatprep.subr.mxu1 %v757_v51  ;;  %p742_p3 = por %p741_p2, %p740_p1 }
  0x26   :  { %672 = vmatpush3.msra.mxu0 %v240_v36  ;;  %710 = vmatprep.mubr.msk.f32.mxu1 %vm758_vm0, %v757_v51 }
  0x27   :  { %673 = vmatprep.subr.mxu0 %v239_v37  ;;  %726 = vset.pattern.permute.xlu0 %v759_v63  ;;  %p743_p4 = pnand %p742_p3, %p736_p0 }
  0x28   :  { %674 = vmatpush3.msra.mxu0 %v239_v37 }
  0x29   :  { %675 = vmatprep.subr.mxu0 %v238_v38 }
  0x2a   :  { %676 = vmatpush3.msra.mxu0 %v238_v38 }
  0x2b   :  { %677 = vmatprep.subr.mxu0 %v237_v39 }
  0x2c   :  { %678 = vmatpush3.msra.mxu0 %v237_v39 }
  0x2d   :  { %679 = vmatprep.subr.mxu0 %v236_v40 }
  0x2e   :  { %680 = vmatpush3.msra.mxu0 %v236_v40 }
  0x2f   :  { %681 = vmatprep.subr.mxu0 %v235_v41 }
  0x30   :  { %682 = vmatpush3.msra.mxu0 %v235_v41 }
  0x31   :  { %683 = vmatprep.subr.mxu0 %v234_v42 }
  0x32   :  { %684 = vmatpush3.msra.mxu0 %v234_v42 }
  0x33   :  { %685 = vmatprep.subr.mxu0 %v233_v43 }
  0x34   :  { %686 = vmatpush3.msra.mxu0 %v233_v43 }
  0x35   :  { %687 = vmatprep.subr.mxu0 %v232_v44 }
  0x36   :  { %688 = vmatpush3.msra.mxu0 %v232_v44 }
  0x37   :  { %689 = vmatprep.subr.mxu0 %v231_v45 }
  0x38   :  { %690 = vmatpush3.msra.mxu0 %v231_v45 }
  0x39   :  { %691 = vmatprep.subr.mxu0 %v230_v46 }
  0x3a   :  { %692 = vmatpush3.msra.mxu0 %v230_v46 }
  0x3b   :  { %693 = vmatprep.subr.mxu0 %v229_v47 }
  0x3c   :  { %694 = vmatpush3.msra.mxu0 %v229_v47 }
  0x3d   :  { %695 = vmatprep.subr.mxu0 %v228_v48 }
  0x3e   :  { %696 = vmatpush3.msra.mxu0 %v228_v48 }
  0x3f   :  { %697 = vmatprep.subr.mxu0 %v227_v49 }
  0x40   :  { %698 = vmatpush3.msra.mxu0 %v227_v49 }
  0x41   :  { %699 = vmatprep.subr.mxu0 %v226_v50 }
  0x42   :  { %700 = vmatpush3.msra.mxu0 %v226_v50 }
  0x43   :  { %701 = vmatprep.subr.mxu0 %v225_v52 }
  0x44   :  { %702 = vmatpush3.msra.mxu0 %v225_v52 }
  0xe4   :  { %v635_v53 = vpop.f32.mrf.mxu0  ;;  %v670_v54 = vpop.f32.mrf.mxu1 }
  0xe5   :  { %v213_v56 = vadd.f32 %v670_v54, %v635_v53 }
  0xe6   :  { %v132_v57 = vpop.f32.mrf.mxu0  ;;  %v207_v58 = vpop.f32.mrf.mxu1 }
  0xe7   :  { %v224_v59 = vadd.f32 %v537_v55, %v213_v56  ;;  %v208_v60 = vadd.f32 %v207_v58, %v132_v57 }
  0xe9   :  { %v223_v61 = vadd.f32 %v537_v55, %v208_v60  ;;  %707 = vmatpush3.xpose.msra.mxu1 %v224_v59 }
  0xea   :  { %708 = vmatprep.subr.mxu1 %v757_v51 }
  0xeb   :  { %703 = vmatprep.mubr.f32.mxu0 %v223_v61 }
  0xec   :  { %704 = vmatmul.mubr.f32.vlgmr.msra.gmra.mxu0 %v224_v59 }
  0xed   :  { %709 = vmatpush3.xpose.msra.mxu1 %v223_v61 }
  0xee   :  { %713 = vmatprep.subr.mxu1 %v224_v59 }
  0xf0   :  { %711 = vmatmul.mubr.f32.vlgmr.msra.gmra.mxu1 %v316_v62 }
  0xf1   :  { %714 = vmatpush3.msra.mxu1 %v224_v59 }
  0xf2   :  { %715 = vmatprep.subr.mxu1 %v223_v61 }
  0xf3   :  { %716 = vmatpush3.msra.mxu1 %v223_v61 }
 0x1ac   :  { %v705_v0 = vpop.f32.mrf.mxu0 }
 0x1ae   :  { %v307_v1 = vpop.f32.mrf.mxu0 }
 0x1af   :  { %389 = vperm.xlu0 %726, %v307_v1  }
 0x1b0   :  { %v383_v2 = vpop.f32.mrf.mxu1 }
 0x1b1   :  { %v400_v7 = vrot.slane %v383_v2, %v399_v6 }
 0x1b2   :  { %v712_v3 = vpop.f32.mrf.mxu1 }
 0x1b3   :  { %394 = vperm.xlu0 %726, %v705_v0  }
 0x22a   :  { %v390_v8 = vpop.permute.xlu0 %389 }
 0x22b   :  { %v401_v9 = vadd.f32 %v400_v7, %v390_v8 }
 0x22d   :  { %v405_v10 = vmul.f32 0.01, %v401_v9  ;;  %vm403_vm1 = vcmp.ge.f32.partialorder %v401_v9, 0.0 }
 0x22e   :  { %v395_v12 = vpop.permute.xlu0 %394 }
 0x22f   :  { %v402_v13 = vadd.f32 %v400_v7, %v395_v12  ;;  %v407_v14 = vsel %vm403_vm1, %v401_v9, %v405_v10 }
 0x230   :  { %v411_v15 = vadd.f32 %v409_v11, %v407_v14 }
 0x231   :  { %vm404_vm3 = vcmp.ge.f32.partialorder %v402_v13, 0.0  ;;  %v406_v16 = vmul.f32 0.01, %v402_v13 }
 0x232   :  { %v414_v18 = vsel %vm413_vm2, %v411_v15, -inf }
 0x233   :  { %415 = vmax.xlane.f32.xlu1 %v414_v18  ;;  %v408_v19 = vsel %vm404_vm3, %v402_v13, %v406_v16 }
 0x234   :  { %v412_v20 = vadd.f32 %v410_v17, %v408_v19 }
 0x236   :  { %v417_v21 = vsel %vm413_vm2, %v412_v20, -inf }
 0x237   :  { %418 = vmax.xlane.f32.xlu1 %v417_v21 }
 0x2bc   :  { %v416_v22 = vpop.xlane.xlu1 %415 }
 0x2bd   :  { %v420_v23 = vsub.f32 %v411_v15, %v416_v22 }
 0x2bf   :  { %v422_v24 = vmul.f32 1.442695, %v420_v23 }
 0x2c0   :  { %v419_v25 = vpop.xlane.xlu1 %418 }
 0x2c1   :  { %727 = vpow2.f32 %v422_v24  ;;  %v421_v26 = vsub.f32 %v412_v20, %v419_v25 }
 0x2c3   :  { %v424_v27 = vmul.f32 1.442695, %v421_v26 }
 0x2c5   :  { %729 = vpow2.f32 %v424_v27 }
 0x2ce   :  { %v728_v28 = vpop.eup %727 }
 0x2cf   :  { %v426_v29 = vsel %vm413_vm2, %v728_v28, 0.0 }
 0x2d0   :  { %427 = vadd.xlane.f32.xlu0 %v426_v29 }
 0x2d2   :  { %v730_v30 = vpop.eup %729 }
 0x2d3   :  { %v429_v31 = vsel %vm413_vm2, %v730_v30, 0.0 }
 0x2d4   :  { %430 = vadd.xlane.f32.xlu1 %v429_v31 }
 0x359   :  { %v428_v32 = vpop.xlane.xlu0 %427 }
 0x35a   :  { %731 = vrcp.f32 %v428_v32 }
 0x35d   :  { %v431_v33 = vpop.xlane.xlu1 %430 }
 0x35e   :  { %733 = vrcp.f32 %v431_v33 }
 0x367   :  { %v732_v34 = vpop.eup %731 }
 0x368   :  { %v434_v35 = vmul.f32 %v732_v34, %v728_v28 }
 0x36a   :  { %717 = vmatprep.mubr.msk.f32.mxu1 %vm413_vm2, %v434_v35 }
 0x36b   :  { %v734_v36 = vpop.eup %733 }
 0x36c   :  { %v435_v37 = vmul.f32 %v734_v36, %v730_v30 }
 0x36e   :  { %718 = vmatmul.mubr.msk.f32.vlgmr.msra.gmra.mxu1 %vm413_vm2, %v435_v37 }
 0x42e   :  { %v719_v38 = vpop.f32.mrf.mxu1 }
 0x42f   :  { %v518_v39 = vmax.f32 %v719_v38, 0.0 }
 0x430   :  { %v508_v40 = vpop.f32.mrf.mxu1 }
 0x431   :  { %520 = vst [vmem:[#allocation2 + $0x8] sm:$0xff] %v518_v39  ;;  %v517_v41 = vmax.f32 %v508_v40, 0.0 }
 0x433   :  { %519 = vst [vmem:[#allocation2] sm:$0xff] %v517_v41 }
 0x434   :  { %746 = shalt.err (!%p743_p4)
}
 0x435   :  { %s761_s20 = smov 128   ;;  %s762_s21 = smov 8  }
 0x436   :  { %532 = dma.vmem_to_hbm [thread:$0]  %s527_s18, 256, %s993_s8, [#allocation3], %s761_s20, %s761_s20, %s762_s21  }
 0x437   :  { %755 = dma.done.wait [#allocation3], 256  }
 0x438   :  { %756 = vsyncadd [#allocation3], 4294967040 }
 0x439   :  { %536 = vsyncpa [#allocation3], 1 }

</bundles_post_ra>
